<compile_context>
chip_gen: v6e
topology: v6e:2x2x1
jax: 0.10.0
libtpu: 0.0.40
codegen_flags: <defaults>
</compile_context>

<pallas_src>
import functools

import jax
import jax.numpy as jnp
from jax.experimental import pallas as pl
from jax.experimental.pallas import tpu as pltpu

LANE = 128          # lane width / padded H / padded E / padded tag_dim
T_CHUNK = 8         # timesteps per grid step (chunk buffers stay small for v7x VMEM)
UNROLL = 8          # bounded unroll of the in-chunk recurrence loop
NEG_BIG = -1e30     # mask value for padded tag lanes (exp() underflows to 0)


# --------------------------------------------------------------------------
# Fused kernel, one time-chunk per grid step.
# Gate order matches PyTorch nn.LSTM: [i, f, g, o].
#   inputs : x (Tc,Bp,128) bf16, w_ih (128,512) bf16, w_hh (128,512) bf16,
#            b (1,512) f32, w_tag (128,128) bf16, b_tag (1,128) f32
#   output : scores (Tc,Bp,128) f32
#   scratch: pre (Tc,Bp,512) f32, hs (Tc,Bp,128) f32, h (Bp,128) f32, c (Bp,128) f32
# --------------------------------------------------------------------------
def fused_lstm_tag_kernel(x_ref, w_ih_ref, w_hh_ref, b_ref, wt_ref, bt_ref,
                          out_ref, pre_ref, hs_ref, h_ref, c_ref):
    Tc, Bp, _ = x_ref.shape
    Hp = LANE

    # h/c carried across time chunks in VMEM scratch; zero them on the first chunk.
    @pl.when(pl.program_id(0) == 0)
    def _():
        h_ref[...] = jnp.zeros_like(h_ref)
        c_ref[...] = jnp.zeros_like(c_ref)

    # Hoisted input projection for the whole chunk: one (Tc*Bp,128)x(128,512) bf16
    # MXU matmul with the bias folded in (broadcast emitted once, not per step).
    x_all = x_ref[...].reshape(Tc * Bp, LANE)                       # bf16
    pre = jnp.dot(x_all, w_ih_ref[...], preferred_element_type=jnp.float32)
    pre_ref[...] = (pre + b_ref[...]).reshape(Tc, Bp, 4 * Hp)       # f32

    w_hh = w_hh_ref[...]   # bf16, hoisted out of the loop

    def step(t, carry):
        h, c = carry
        # Recurrent half only: (Bp,128) x (128,512) bf16 MXU matmul, f32 accumulate.
        gates = pre_ref[t] + jnp.dot(h.astype(jnp.bfloat16), w_hh,
                                     preferred_element_type=jnp.float32)
        i_g = jax.nn.sigmoid(gates[:, 0 * Hp:1 * Hp])
        f_g = jax.nn.sigmoid(gates[:, 1 * Hp:2 * Hp])
        g_g = jnp.tanh(gates[:, 2 * Hp:3 * Hp])
        o_g = jax.nn.sigmoid(gates[:, 3 * Hp:4 * Hp])
        c_new = f_g * c + i_g * g_g
        h_new = o_g * jnp.tanh(c_new)
        hs_ref[t] = h_new          # stash h; head applied in batch after the loop
        return (h_new, c_new)

    h_fin, c_fin = jax.lax.fori_loop(0, Tc, step, (h_ref[...], c_ref[...]),
                                     unroll=min(Tc, UNROLL))
    h_ref[...] = h_fin
    c_ref[...] = c_fin

    # Batched head for the whole chunk (off the serial critical path):
    # ReLU -> Linear(H, tag) -> log_softmax.  Softmax math in f32; padded tag
    # lanes masked by the -1e30 bias so exp() underflows to 0 there.
    h_all = hs_ref[...].reshape(Tc * Bp, Hp)
    a = jnp.maximum(h_all, 0.0).astype(jnp.bfloat16)
    logits = jnp.dot(a, wt_ref[...], preferred_element_type=jnp.float32) + bt_ref[...]
    m = jnp.max(logits, axis=-1, keepdims=True)
    s = logits - m
    lse = jnp.log(jnp.sum(jnp.exp(s), axis=-1, keepdims=True))
    out_ref[...] = (s - lse).reshape(Tc, Bp, LANE).astype(out_ref.dtype)


def fused_forward(x_pad, w_ih, w_hh, b, w_tag, b_tag):
    """x_pad: (Tp, Bp, LANE) bf16; returns (Tp, Bp, LANE) f32 log-softmax scores."""
    Tp, Bp, _ = x_pad.shape
    n_chunks = Tp // T_CHUNK
    return pl.pallas_call(
        fused_lstm_tag_kernel,
        out_shape=jax.ShapeDtypeStruct((Tp, Bp, LANE), jnp.float32),
        grid_spec=pltpu.PrefetchScalarGridSpec(
            num_scalar_prefetch=0,
            grid=(n_chunks,),
            in_specs=[
                pl.BlockSpec((T_CHUNK, Bp, LANE), lambda t: (t, 0, 0)),
                pl.BlockSpec((LANE, 4 * LANE), lambda t: (0, 0)),
                pl.BlockSpec((LANE, 4 * LANE), lambda t: (0, 0)),
                pl.BlockSpec((1, 4 * LANE), lambda t: (0, 0)),
                pl.BlockSpec((LANE, LANE), lambda t: (0, 0)),
                pl.BlockSpec((1, LANE), lambda t: (0, 0)),
            ],
            out_specs=pl.BlockSpec((T_CHUNK, Bp, LANE), lambda t: (t, 0, 0)),
            scratch_shapes=[
                pltpu.VMEM((T_CHUNK, Bp, 4 * LANE), jnp.float32),   # pre-activations
                pltpu.VMEM((T_CHUNK, Bp, LANE), jnp.float32),       # per-step h
                pltpu.VMEM((Bp, LANE), jnp.float32),                # h carry
                pltpu.VMEM((Bp, LANE), jnp.float32),                # c carry
            ],
        ),
        compiler_params=pltpu.CompilerParams(
            # Time chunks carry h/c state, so the grid axis is serial.
            dimension_semantics=("arbitrary",),
        ),
    )(x_pad, w_ih, w_hh, b, w_tag, b_tag)


# --------------------------------------------------------------------------
# Parameter preparation: pad to vreg-friendly shapes, MXU operands in bf16.
# Zero padding is exact in bf16, so padded lanes cannot leak into real channels.
# --------------------------------------------------------------------------
def pad_params(params):
    E = params["w_ih"].shape[0]
    H = params["w_hh"].shape[0]
    tag_dim = params["w_tag"].shape[1]
    Hp = LANE

    emb = params["embedding"]
    emb_pad = (jnp.zeros((emb.shape[0], LANE), jnp.float32)
               .at[:, :E].set(emb).astype(jnp.bfloat16))

    def pad_gate_cols(w):  # (K, 4H) -> (K, 4*Hp), each gate placed at g*Hp
        out = jnp.zeros((w.shape[0], 4 * Hp), jnp.float32)
        for g in range(4):
            out = out.at[:, g * Hp:g * Hp + H].set(w[:, g * H:(g + 1) * H])
        return out

    w_ih_pad = (jnp.zeros((LANE, 4 * Hp), jnp.float32)
                .at[:E, :].set(pad_gate_cols(params["w_ih"])).astype(jnp.bfloat16))
    w_hh_pad = (jnp.zeros((LANE, 4 * Hp), jnp.float32)
                .at[:H, :].set(pad_gate_cols(params["w_hh"])).astype(jnp.bfloat16))
    b_comb = pad_gate_cols(params["b_lstm"])  # (1, 4*Hp) f32, zero on padded lanes

    w_tag_pad = (jnp.zeros((Hp, LANE), jnp.float32)
                 .at[:H, :tag_dim].set(params["w_tag"]).astype(jnp.bfloat16))
    b_tag_pad = jnp.full((1, LANE), NEG_BIG, jnp.float32).at[0, :tag_dim].set(
        params["b_tag"][0])

    return {
        "embedding": emb_pad,
        "w_ih": w_ih_pad,
        "w_hh": w_hh_pad,
        "b_lstm": b_comb,
        "w_tag": w_tag_pad,
        "b_tag": b_tag_pad,
    }


# --------------------------------------------------------------------------
# Full MyLSTM.forward (tags=None branch).  Dropout is identity in eval mode.
# --------------------------------------------------------------------------
@functools.partial(jax.jit, static_argnames=("tag_dim",))
def my_lstm_forward(sentence, sentence_lens, padded_params, tag_dim):
    del sentence_lens  # unused, exactly like the PyTorch reference forward
    B, T = sentence.shape
    Bp = max(8, pl.cdiv(B, 8) * 8)
    Tp = pl.cdiv(T, T_CHUNK) * T_CHUNK

    # Embedding lookup emitted directly time-major (no activation transpose later).
    # TODO(synk): embedding gather could be fused into the kernel via scalar-prefetched
    # token ids + in-kernel gather; kept in XLA since it is negligible at these sizes.
    x_tbe = jnp.take(padded_params["embedding"], sentence.T, axis=0)   # (T, B, LANE) bf16
    x_pad = jnp.pad(x_tbe, ((0, Tp - T), (0, Bp - B), (0, 0)))         # (Tp, Bp, LANE)

    scores_pad = fused_forward(
        x_pad,
        padded_params["w_ih"],
        padded_params["w_hh"],
        padded_params["b_lstm"],
        padded_params["w_tag"],
        padded_params["b_tag"],
    )  # (Tp, Bp, LANE) f32

    tag_scores = jnp.transpose(scores_pad[:T, :B, :tag_dim], (1, 0, 2))  # (B, T, tag_dim)
    return tag_scores, None


def init_params(key, vocab_size, embedding_dim=30, hidden_dim=50, tag_dim=2):
    ks = jax.random.split(key, 6)
    scale = 0.1
    return {
        # nn.Embedding(vocab_size, E)
        "embedding": scale * jax.random.normal(ks[0], (vocab_size, embedding_dim), jnp.float32),
        # nn.LSTM weights, pre-transposed for x @ W: (E, 4H), (H, 4H); bias = b_ih + b_hh.
        "w_ih": scale * jax.random.normal(ks[1], (embedding_dim, 4 * hidden_dim), jnp.float32),
        "w_hh": scale * jax.random.normal(ks[2], (hidden_dim, 4 * hidden_dim), jnp.float32),
        "b_lstm": scale * jax.random.normal(ks[3], (1, 4 * hidden_dim), jnp.float32),
        # nn.Linear(H, tag_dim), pre-transposed: (H, tag_dim)
        "w_tag": scale * jax.random.normal(ks[4], (hidden_dim, tag_dim), jnp.float32),
        "b_tag": scale * jax.random.normal(ks[5], (1, tag_dim), jnp.float32),
    }


# Pure-JAX f32 reference for correctness checking.
def reference_forward(sentence, params):
    emb = params["embedding"][sentence]                     # (B, T, E)
    W_ih, W_hh, b = params["w_ih"], params["w_hh"], params["b_lstm"]
    H = W_hh.shape[0]
    B = sentence.shape[0]

    def step(carry, x_t):
        h, c = carry
        gates = x_t @ W_ih + h @ W_hh + b
        i = jax.nn.sigmoid(gates[:, 0 * H:1 * H])
        f = jax.nn.sigmoid(gates[:, 1 * H:2 * H])
        g = jnp.tanh(gates[:, 2 * H:3 * H])
        o = jax.nn.sigmoid(gates[:, 3 * H:4 * H])
        c = f * c + i * g
        h = o * jnp.tanh(c)
        return (h, c), h

    init = (jnp.zeros((B, H), jnp.float32), jnp.zeros((B, H), jnp.float32))
    _, hs = jax.lax.scan(step, init, jnp.transpose(emb, (1, 0, 2)))
    lstm_out = jnp.transpose(hs, (1, 0, 2))                 # (B, T, H)
    x = jnp.maximum(lstm_out, 0.0)
    logits = x @ params["w_tag"] + params["b_tag"]
    return jax.nn.log_softmax(logits, axis=-1)


if __name__ == "__main__":
    key = jax.random.PRNGKey(0)
    vocab_size, embedding_dim, hidden_dim, tag_dim = 100, 30, 50, 2
    B, T = 2, 8

    k_param, k_sent = jax.random.split(key)
    params = init_params(k_param, vocab_size, embedding_dim, hidden_dim, tag_dim)
    padded = pad_params(params)

    sentence = jax.random.randint(k_sent, (B, T), 0, vocab_size, dtype=jnp.int32)
    sentence_lens = jnp.full((B,), T, dtype=jnp.int32)  # accepted but unused (matches reference)

    tag_scores, loss = my_lstm_forward(sentence, sentence_lens, padded, tag_dim)
    jax.block_until_ready(tag_scores)

    assert tag_scores.shape == (B, T, tag_dim)
    assert loss is None
    # log_softmax rows must sum to ~1 in prob space (softmax math is f32)
    probs_sum = jnp.sum(jnp.exp(tag_scores), axis=-1)
    assert jnp.allclose(probs_sum, 1.0, atol=1e-5)
    # match the pure-JAX f32 reference (tolerance accounts for bf16 MXU operands)
    ref = reference_forward(sentence, params)
    assert jnp.allclose(tag_scores, ref, atol=5e-3, rtol=5e-3)

    print("KERNEL_OK")
</pallas_src>

<mosaic_0001>
module attributes {stable_mosaic.version = 11 : i64} {
  func.func @fused_lstm_tag_kernel(%arg0: i32, %arg1: memref<8x8x128xbf16, #tpu.memory_space<vmem>>, %arg2: memref<128x512xbf16, #tpu.memory_space<vmem>>, %arg3: memref<128x512xbf16, #tpu.memory_space<vmem>>, %arg4: memref<1x512xf32, #tpu.memory_space<vmem>>, %arg5: memref<128x128xbf16, #tpu.memory_space<vmem>>, %arg6: memref<1x128xf32, #tpu.memory_space<vmem>>, %arg7: memref<8x8x128xf32, #tpu.memory_space<vmem>>, %arg8: memref<8x8x512xf32, #tpu.memory_space<vmem>>, %arg9: memref<8x8x128xf32, #tpu.memory_space<vmem>>, %arg10: memref<8x128xf32, #tpu.memory_space<vmem>>, %arg11: memref<8x128xf32, #tpu.memory_space<vmem>>) attributes {dimension_semantics = [#tpu.dimension_semantics<arbitrary>], iteration_bounds = array<i64: 1>, scalar_prefetch = 0 : i64, scratch_operands = 4 : i64, tpu.core_type = #tpu.core_type<tc>, window_params = [{transform_indices = @transform_0, window_bounds = array<i64: 8, 8, 128>}, {pipeline_mode = #tpu.pipeline_mode<synchronous>, transform_indices = @transform_1, window_bounds = array<i64: 128, 512>}, {pipeline_mode = #tpu.pipeline_mode<synchronous>, transform_indices = @transform_2, window_bounds = array<i64: 128, 512>}, {pipeline_mode = #tpu.pipeline_mode<synchronous>, transform_indices = @transform_3, window_bounds = array<i64: 1, 512>}, {pipeline_mode = #tpu.pipeline_mode<synchronous>, transform_indices = @transform_4, window_bounds = array<i64: 128, 128>}, {pipeline_mode = #tpu.pipeline_mode<synchronous>, transform_indices = @transform_5, window_bounds = array<i64: 1, 128>}, {transform_indices = @transform_6, window_bounds = array<i64: 8, 8, 128>}]} {
    %c0_i32 = arith.constant 0 : i32
    %0 = arith.cmpi eq, %arg0, %c0_i32 : i32
    %1 = arith.extui %0 : i1 to i32
    %c0_i32_0 = arith.constant 0 : i32
    %2 = arith.cmpi ne, %1, %c0_i32_0 : i32
    scf.if %2 {
      %cst_99 = arith.constant 0.000000e+00 : f32
      %319 = vector.broadcast %cst_99 : f32 to vector<8x128xf32>
      %c0_100 = arith.constant 0 : index
      %c0_101 = arith.constant 0 : index
      %320 = vector.load %arg10[%c0_100, %c0_101] : memref<8x128xf32, #tpu.memory_space<vmem>>, vector<8x128xf32>
      tpu.vector_store %arg10[%c0_100, %c0_101], %319 {strides = array<i32>} : memref<8x128xf32, #tpu.memory_space<vmem>>, vector<8x128xf32>,
      %cst_102 = arith.constant 0.000000e+00 : f32
      %321 = vector.broadcast %cst_102 : f32 to vector<8x128xf32>
      %c0_103 = arith.constant 0 : index
      %c0_104 = arith.constant 0 : index
      %322 = vector.load %arg11[%c0_103, %c0_104] : memref<8x128xf32, #tpu.memory_space<vmem>>, vector<8x128xf32>
      tpu.vector_store %arg11[%c0_103, %c0_104], %321 {strides = array<i32>} : memref<8x128xf32, #tpu.memory_space<vmem>>, vector<8x128xf32>,
    } else {
    }
    %c0 = arith.constant 0 : index
    %c0_1 = arith.constant 0 : index
    %c0_2 = arith.constant 0 : index
    %3 = vector.load %arg1[%c0, %c0_1, %c0_2] : memref<8x8x128xbf16, #tpu.memory_space<vmem>>, vector<8x8x128xbf16>
    %4 = vector.shape_cast %3 : vector<8x8x128xbf16> to vector<64x128xbf16>
    %c0_3 = arith.constant 0 : index
    %c0_4 = arith.constant 0 : index
    %5 = vector.load %arg2[%c0_3, %c0_4] : memref<128x512xbf16, #tpu.memory_space<vmem>>, vector<128x512xbf16>
    %cst = arith.constant dense<0.000000e+00> : vector<64x512xf32>
    %6 = tpu.matmul %4, %5, %cst {dimension_numbers = #tpu.dot_dimension_numbers<[1], [0], [0], [1], [0, 0, 1, 1], [], []>} : vector<64x128xbf16>, vector<128x512xbf16>, vector<64x512xf32> -> vector<64x512xf32>
    %c0_5 = arith.constant 0 : index
    %c0_6 = arith.constant 0 : index
    %7 = vector.load %arg4[%c0_5, %c0_6] : memref<1x512xf32, #tpu.memory_space<vmem>>, vector<1x512xf32>
    %8 = vector.broadcast %7 : vector<1x512xf32> to vector<64x512xf32>
    %9 = arith.addf %6, %8 : vector<64x512xf32>
    %10 = vector.shape_cast %9 : vector<64x512xf32> to vector<8x8x512xf32>
    %c0_7 = arith.constant 0 : index
    %c0_8 = arith.constant 0 : index
    %c0_9 = arith.constant 0 : index
    %11 = vector.load %arg8[%c0_7, %c0_8, %c0_9] : memref<8x8x512xf32, #tpu.memory_space<vmem>>, vector<8x8x512xf32>
    tpu.vector_store %arg8[%c0_7, %c0_8, %c0_9], %10 {strides = array<i32>} : memref<8x8x512xf32, #tpu.memory_space<vmem>>, vector<8x8x512xf32>,
    %c0_10 = arith.constant 0 : index
    %c0_11 = arith.constant 0 : index
    %12 = vector.load %arg3[%c0_10, %c0_11] : memref<128x512xbf16, #tpu.memory_space<vmem>>, vector<128x512xbf16>
    %c0_12 = arith.constant 0 : index
    %c0_13 = arith.constant 0 : index
    %13 = vector.load %arg10[%c0_12, %c0_13] : memref<8x128xf32, #tpu.memory_space<vmem>>, vector<8x128xf32>
    %c0_14 = arith.constant 0 : index
    %c0_15 = arith.constant 0 : index
    %14 = vector.load %arg11[%c0_14, %c0_15] : memref<8x128xf32, #tpu.memory_space<vmem>>, vector<8x128xf32>
    %c0_i32_16 = arith.constant 0 : i32
    %15 = arith.index_cast %c0_i32_16 : i32 to index
    %c0_17 = arith.constant 0 : index
    %c0_18 = arith.constant 0 : index
    %16 = vector.load %arg8[%15, %c0_17, %c0_18] : memref<8x8x512xf32, #tpu.memory_space<vmem>>, vector<1x8x512xf32>
    %17 = vector.shape_cast %16 : vector<1x8x512xf32> to vector<8x512xf32>
    %18 = arith.truncf %13 : vector<8x128xf32> to vector<8x128xbf16>
    %cst_19 = arith.constant dense<0.000000e+00> : vector<8x512xf32>
    %19 = tpu.matmul %18, %12, %cst_19 {dimension_numbers = #tpu.dot_dimension_numbers<[1], [0], [0], [1], [0, 0, 1, 1], [], []>} : vector<8x128xbf16>, vector<128x512xbf16>, vector<8x512xf32> -> vector<8x512xf32>
    %20 = arith.addf %17, %19 : vector<8x512xf32>
    %21 = vector.extract_strided_slice %20 {offsets = [0, 0], sizes = [8, 128], strides = [1, 1]} : vector<8x512xf32> to vector<8x128xf32>
    %22 = arith.negf %21 : vector<8x128xf32>
    %23 = math.exp %22 : vector<8x128xf32>
    %cst_20 = arith.constant 1.000000e+00 : f32
    %24 = vector.broadcast %cst_20 : f32 to vector<8x128xf32>
    %25 = arith.addf %24, %23 : vector<8x128xf32>
    %26 = arith.divf %24, %25 : vector<8x128xf32>
    %27 = vector.extract_strided_slice %20 {offsets = [0, 128], sizes = [8, 128], strides = [1, 1]} : vector<8x512xf32> to vector<8x128xf32>
    %28 = arith.negf %27 : vector<8x128xf32>
    %29 = math.exp %28 : vector<8x128xf32>
    %cst_21 = arith.constant 1.000000e+00 : f32
    %30 = vector.broadcast %cst_21 : f32 to vector<8x128xf32>
    %31 = arith.addf %30, %29 : vector<8x128xf32>
    %32 = arith.divf %30, %31 : vector<8x128xf32>
    %33 = vector.extract_strided_slice %20 {offsets = [0, 256], sizes = [8, 128], strides = [1, 1]} : vector<8x512xf32> to vector<8x128xf32>
    %34 = math.tanh %33 : vector<8x128xf32>
    %35 = vector.extract_strided_slice %20 {offsets = [0, 384], sizes = [8, 128], strides = [1, 1]} : vector<8x512xf32> to vector<8x128xf32>
    %36 = arith.negf %35 : vector<8x128xf32>
    %37 = math.exp %36 : vector<8x128xf32>
    %cst_22 = arith.constant 1.000000e+00 : f32
    %38 = vector.broadcast %cst_22 : f32 to vector<8x128xf32>
    %39 = arith.addf %38, %37 : vector<8x128xf32>
    %40 = arith.divf %38, %39 : vector<8x128xf32>
    %41 = arith.mulf %32, %14 : vector<8x128xf32>
    %42 = arith.mulf %26, %34 : vector<8x128xf32>
    %43 = arith.addf %41, %42 : vector<8x128xf32>
    %44 = math.tanh %43 : vector<8x128xf32>
    %45 = arith.mulf %40, %44 : vector<8x128xf32>
    %46 = arith.index_cast %c0_i32_16 : i32 to index
    %c0_23 = arith.constant 0 : index
    %c0_24 = arith.constant 0 : index
    %47 = vector.load %arg9[%46, %c0_23, %c0_24] : memref<8x8x128xf32, #tpu.memory_space<vmem>>, vector<1x8x128xf32>
    %48 = vector.shape_cast %47 : vector<1x8x128xf32> to vector<8x128xf32>
    %49 = vector.shape_cast %45 : vector<8x128xf32> to vector<1x8x128xf32>
    tpu.vector_store %arg9[%46, %c0_23, %c0_24], %49 {strides = array<i32>} : memref<8x8x128xf32, #tpu.memory_space<vmem>>, vector<1x8x128xf32>,
    %c1_i32 = arith.constant 1 : i32
    %50 = arith.index_cast %c1_i32 : i32 to index
    %c0_25 = arith.constant 0 : index
    %c0_26 = arith.constant 0 : index
    %51 = vector.load %arg8[%50, %c0_25, %c0_26] : memref<8x8x512xf32, #tpu.memory_space<vmem>>, vector<1x8x512xf32>
    %52 = vector.shape_cast %51 : vector<1x8x512xf32> to vector<8x512xf32>
    %53 = arith.truncf %45 : vector<8x128xf32> to vector<8x128xbf16>
    %cst_27 = arith.constant dense<0.000000e+00> : vector<8x512xf32>
    %54 = tpu.matmul %53, %12, %cst_27 {dimension_numbers = #tpu.dot_dimension_numbers<[1], [0], [0], [1], [0, 0, 1, 1], [], []>} : vector<8x128xbf16>, vector<128x512xbf16>, vector<8x512xf32> -> vector<8x512xf32>
    %55 = arith.addf %52, %54 : vector<8x512xf32>
    %56 = vector.extract_strided_slice %55 {offsets = [0, 0], sizes = [8, 128], strides = [1, 1]} : vector<8x512xf32> to vector<8x128xf32>
    %57 = arith.negf %56 : vector<8x128xf32>
    %58 = math.exp %57 : vector<8x128xf32>
    %cst_28 = arith.constant 1.000000e+00 : f32
    %59 = vector.broadcast %cst_28 : f32 to vector<8x128xf32>
    %60 = arith.addf %59, %58 : vector<8x128xf32>
    %61 = arith.divf %59, %60 : vector<8x128xf32>
    %62 = vector.extract_strided_slice %55 {offsets = [0, 128], sizes = [8, 128], strides = [1, 1]} : vector<8x512xf32> to vector<8x128xf32>
    %63 = arith.negf %62 : vector<8x128xf32>
    %64 = math.exp %63 : vector<8x128xf32>
    %cst_29 = arith.constant 1.000000e+00 : f32
    %65 = vector.broadcast %cst_29 : f32 to vector<8x128xf32>
    %66 = arith.addf %65, %64 : vector<8x128xf32>
    %67 = arith.divf %65, %66 : vector<8x128xf32>
    %68 = vector.extract_strided_slice %55 {offsets = [0, 256], sizes = [8, 128], strides = [1, 1]} : vector<8x512xf32> to vector<8x128xf32>
    %69 = math.tanh %68 : vector<8x128xf32>
    %70 = vector.extract_strided_slice %55 {offsets = [0, 384], sizes = [8, 128], strides = [1, 1]} : vector<8x512xf32> to vector<8x128xf32>
    %71 = arith.negf %70 : vector<8x128xf32>
    %72 = math.exp %71 : vector<8x128xf32>
    %cst_30 = arith.constant 1.000000e+00 : f32
    %73 = vector.broadcast %cst_30 : f32 to vector<8x128xf32>
    %74 = arith.addf %73, %72 : vector<8x128xf32>
    %75 = arith.divf %73, %74 : vector<8x128xf32>
    %76 = arith.mulf %67, %43 : vector<8x128xf32>
    %77 = arith.mulf %61, %69 : vector<8x128xf32>
    %78 = arith.addf %76, %77 : vector<8x128xf32>
    %79 = math.tanh %78 : vector<8x128xf32>
    %80 = arith.mulf %75, %79 : vector<8x128xf32>
    %81 = arith.index_cast %c1_i32 : i32 to index
    %c0_31 = arith.constant 0 : index
    %c0_32 = arith.constant 0 : index
    %82 = vector.load %arg9[%81, %c0_31, %c0_32] : memref<8x8x128xf32, #tpu.memory_space<vmem>>, vector<1x8x128xf32>
    %83 = vector.shape_cast %82 : vector<1x8x128xf32> to vector<8x128xf32>
    %84 = vector.shape_cast %80 : vector<8x128xf32> to vector<1x8x128xf32>
    tpu.vector_store %arg9[%81, %c0_31, %c0_32], %84 {strides = array<i32>} : memref<8x8x128xf32, #tpu.memory_space<vmem>>, vector<1x8x128xf32>,
    %c2_i32 = arith.constant 2 : i32
    %85 = arith.index_cast %c2_i32 : i32 to index
    %c0_33 = arith.constant 0 : index
    %c0_34 = arith.constant 0 : index
    %86 = vector.load %arg8[%85, %c0_33, %c0_34] : memref<8x8x512xf32, #tpu.memory_space<vmem>>, vector<1x8x512xf32>
    %87 = vector.shape_cast %86 : vector<1x8x512xf32> to vector<8x512xf32>
    %88 = arith.truncf %80 : vector<8x128xf32> to vector<8x128xbf16>
    %cst_35 = arith.constant dense<0.000000e+00> : vector<8x512xf32>
    %89 = tpu.matmul %88, %12, %cst_35 {dimension_numbers = #tpu.dot_dimension_numbers<[1], [0], [0], [1], [0, 0, 1, 1], [], []>} : vector<8x128xbf16>, vector<128x512xbf16>, vector<8x512xf32> -> vector<8x512xf32>
    %90 = arith.addf %87, %89 : vector<8x512xf32>
    %91 = vector.extract_strided_slice %90 {offsets = [0, 0], sizes = [8, 128], strides = [1, 1]} : vector<8x512xf32> to vector<8x128xf32>
    %92 = arith.negf %91 : vector<8x128xf32>
    %93 = math.exp %92 : vector<8x128xf32>
    %cst_36 = arith.constant 1.000000e+00 : f32
    %94 = vector.broadcast %cst_36 : f32 to vector<8x128xf32>
    %95 = arith.addf %94, %93 : vector<8x128xf32>
    %96 = arith.divf %94, %95 : vector<8x128xf32>
    %97 = vector.extract_strided_slice %90 {offsets = [0, 128], sizes = [8, 128], strides = [1, 1]} : vector<8x512xf32> to vector<8x128xf32>
    %98 = arith.negf %97 : vector<8x128xf32>
    %99 = math.exp %98 : vector<8x128xf32>
    %cst_37 = arith.constant 1.000000e+00 : f32
    %100 = vector.broadcast %cst_37 : f32 to vector<8x128xf32>
    %101 = arith.addf %100, %99 : vector<8x128xf32>
    %102 = arith.divf %100, %101 : vector<8x128xf32>
    %103 = vector.extract_strided_slice %90 {offsets = [0, 256], sizes = [8, 128], strides = [1, 1]} : vector<8x512xf32> to vector<8x128xf32>
    %104 = math.tanh %103 : vector<8x128xf32>
    %105 = vector.extract_strided_slice %90 {offsets = [0, 384], sizes = [8, 128], strides = [1, 1]} : vector<8x512xf32> to vector<8x128xf32>
    %106 = arith.negf %105 : vector<8x128xf32>
    %107 = math.exp %106 : vector<8x128xf32>
    %cst_38 = arith.constant 1.000000e+00 : f32
    %108 = vector.broadcast %cst_38 : f32 to vector<8x128xf32>
    %109 = arith.addf %108, %107 : vector<8x128xf32>
    %110 = arith.divf %108, %109 : vector<8x128xf32>
    %111 = arith.mulf %102, %78 : vector<8x128xf32>
    %112 = arith.mulf %96, %104 : vector<8x128xf32>
    %113 = arith.addf %111, %112 : vector<8x128xf32>
    %114 = math.tanh %113 : vector<8x128xf32>
    %115 = arith.mulf %110, %114 : vector<8x128xf32>
    %116 = arith.index_cast %c2_i32 : i32 to index
    %c0_39 = arith.constant 0 : index
    %c0_40 = arith.constant 0 : index
    %117 = vector.load %arg9[%116, %c0_39, %c0_40] : memref<8x8x128xf32, #tpu.memory_space<vmem>>, vector<1x8x128xf32>
    %118 = vector.shape_cast %117 : vector<1x8x128xf32> to vector<8x128xf32>
    %119 = vector.shape_cast %115 : vector<8x128xf32> to vector<1x8x128xf32>
    tpu.vector_store %arg9[%116, %c0_39, %c0_40], %119 {strides = array<i32>} : memref<8x8x128xf32, #tpu.memory_space<vmem>>, vector<1x8x128xf32>,
    %c3_i32 = arith.constant 3 : i32
    %120 = arith.index_cast %c3_i32 : i32 to index
    %c0_41 = arith.constant 0 : index
    %c0_42 = arith.constant 0 : index
    %121 = vector.load %arg8[%120, %c0_41, %c0_42] : memref<8x8x512xf32, #tpu.memory_space<vmem>>, vector<1x8x512xf32>
    %122 = vector.shape_cast %121 : vector<1x8x512xf32> to vector<8x512xf32>
    %123 = arith.truncf %115 : vector<8x128xf32> to vector<8x128xbf16>
    %cst_43 = arith.constant dense<0.000000e+00> : vector<8x512xf32>
    %124 = tpu.matmul %123, %12, %cst_43 {dimension_numbers = #tpu.dot_dimension_numbers<[1], [0], [0], [1], [0, 0, 1, 1], [], []>} : vector<8x128xbf16>, vector<128x512xbf16>, vector<8x512xf32> -> vector<8x512xf32>
    %125 = arith.addf %122, %124 : vector<8x512xf32>
    %126 = vector.extract_strided_slice %125 {offsets = [0, 0], sizes = [8, 128], strides = [1, 1]} : vector<8x512xf32> to vector<8x128xf32>
    %127 = arith.negf %126 : vector<8x128xf32>
    %128 = math.exp %127 : vector<8x128xf32>
    %cst_44 = arith.constant 1.000000e+00 : f32
    %129 = vector.broadcast %cst_44 : f32 to vector<8x128xf32>
    %130 = arith.addf %129, %128 : vector<8x128xf32>
    %131 = arith.divf %129, %130 : vector<8x128xf32>
    %132 = vector.extract_strided_slice %125 {offsets = [0, 128], sizes = [8, 128], strides = [1, 1]} : vector<8x512xf32> to vector<8x128xf32>
    %133 = arith.negf %132 : vector<8x128xf32>
    %134 = math.exp %133 : vector<8x128xf32>
    %cst_45 = arith.constant 1.000000e+00 : f32
    %135 = vector.broadcast %cst_45 : f32 to vector<8x128xf32>
    %136 = arith.addf %135, %134 : vector<8x128xf32>
    %137 = arith.divf %135, %136 : vector<8x128xf32>
    %138 = vector.extract_strided_slice %125 {offsets = [0, 256], sizes = [8, 128], strides = [1, 1]} : vector<8x512xf32> to vector<8x128xf32>
    %139 = math.tanh %138 : vector<8x128xf32>
    %140 = vector.extract_strided_slice %125 {offsets = [0, 384], sizes = [8, 128], strides = [1, 1]} : vector<8x512xf32> to vector<8x128xf32>
    %141 = arith.negf %140 : vector<8x128xf32>
    %142 = math.exp %141 : vector<8x128xf32>
    %cst_46 = arith.constant 1.000000e+00 : f32
    %143 = vector.broadcast %cst_46 : f32 to vector<8x128xf32>
    %144 = arith.addf %143, %142 : vector<8x128xf32>
    %145 = arith.divf %143, %144 : vector<8x128xf32>
    %146 = arith.mulf %137, %113 : vector<8x128xf32>
    %147 = arith.mulf %131, %139 : vector<8x128xf32>
    %148 = arith.addf %146, %147 : vector<8x128xf32>
    %149 = math.tanh %148 : vector<8x128xf32>
    %150 = arith.mulf %145, %149 : vector<8x128xf32>
    %151 = arith.index_cast %c3_i32 : i32 to index
    %c0_47 = arith.constant 0 : index
    %c0_48 = arith.constant 0 : index
    %152 = vector.load %arg9[%151, %c0_47, %c0_48] : memref<8x8x128xf32, #tpu.memory_space<vmem>>, vector<1x8x128xf32>
    %153 = vector.shape_cast %152 : vector<1x8x128xf32> to vector<8x128xf32>
    %154 = vector.shape_cast %150 : vector<8x128xf32> to vector<1x8x128xf32>
    tpu.vector_store %arg9[%151, %c0_47, %c0_48], %154 {strides = array<i32>} : memref<8x8x128xf32, #tpu.memory_space<vmem>>, vector<1x8x128xf32>,
    %c4_i32 = arith.constant 4 : i32
    %155 = arith.index_cast %c4_i32 : i32 to index
    %c0_49 = arith.constant 0 : index
    %c0_50 = arith.constant 0 : index
    %156 = vector.load %arg8[%155, %c0_49, %c0_50] : memref<8x8x512xf32, #tpu.memory_space<vmem>>, vector<1x8x512xf32>
    %157 = vector.shape_cast %156 : vector<1x8x512xf32> to vector<8x512xf32>
    %158 = arith.truncf %150 : vector<8x128xf32> to vector<8x128xbf16>
    %cst_51 = arith.constant dense<0.000000e+00> : vector<8x512xf32>
    %159 = tpu.matmul %158, %12, %cst_51 {dimension_numbers = #tpu.dot_dimension_numbers<[1], [0], [0], [1], [0, 0, 1, 1], [], []>} : vector<8x128xbf16>, vector<128x512xbf16>, vector<8x512xf32> -> vector<8x512xf32>
    %160 = arith.addf %157, %159 : vector<8x512xf32>
    %161 = vector.extract_strided_slice %160 {offsets = [0, 0], sizes = [8, 128], strides = [1, 1]} : vector<8x512xf32> to vector<8x128xf32>
    %162 = arith.negf %161 : vector<8x128xf32>
    %163 = math.exp %162 : vector<8x128xf32>
    %cst_52 = arith.constant 1.000000e+00 : f32
    %164 = vector.broadcast %cst_52 : f32 to vector<8x128xf32>
    %165 = arith.addf %164, %163 : vector<8x128xf32>
    %166 = arith.divf %164, %165 : vector<8x128xf32>
    %167 = vector.extract_strided_slice %160 {offsets = [0, 128], sizes = [8, 128], strides = [1, 1]} : vector<8x512xf32> to vector<8x128xf32>
    %168 = arith.negf %167 : vector<8x128xf32>
    %169 = math.exp %168 : vector<8x128xf32>
    %cst_53 = arith.constant 1.000000e+00 : f32
    %170 = vector.broadcast %cst_53 : f32 to vector<8x128xf32>
    %171 = arith.addf %170, %169 : vector<8x128xf32>
    %172 = arith.divf %170, %171 : vector<8x128xf32>
    %173 = vector.extract_strided_slice %160 {offsets = [0, 256], sizes = [8, 128], strides = [1, 1]} : vector<8x512xf32> to vector<8x128xf32>
    %174 = math.tanh %173 : vector<8x128xf32>
    %175 = vector.extract_strided_slice %160 {offsets = [0, 384], sizes = [8, 128], strides = [1, 1]} : vector<8x512xf32> to vector<8x128xf32>
    %176 = arith.negf %175 : vector<8x128xf32>
    %177 = math.exp %176 : vector<8x128xf32>
    %cst_54 = arith.constant 1.000000e+00 : f32
    %178 = vector.broadcast %cst_54 : f32 to vector<8x128xf32>
    %179 = arith.addf %178, %177 : vector<8x128xf32>
    %180 = arith.divf %178, %179 : vector<8x128xf32>
    %181 = arith.mulf %172, %148 : vector<8x128xf32>
    %182 = arith.mulf %166, %174 : vector<8x128xf32>
    %183 = arith.addf %181, %182 : vector<8x128xf32>
    %184 = math.tanh %183 : vector<8x128xf32>
    %185 = arith.mulf %180, %184 : vector<8x128xf32>
    %186 = arith.index_cast %c4_i32 : i32 to index
    %c0_55 = arith.constant 0 : index
    %c0_56 = arith.constant 0 : index
    %187 = vector.load %arg9[%186, %c0_55, %c0_56] : memref<8x8x128xf32, #tpu.memory_space<vmem>>, vector<1x8x128xf32>
    %188 = vector.shape_cast %187 : vector<1x8x128xf32> to vector<8x128xf32>
    %189 = vector.shape_cast %185 : vector<8x128xf32> to vector<1x8x128xf32>
    tpu.vector_store %arg9[%186, %c0_55, %c0_56], %189 {strides = array<i32>} : memref<8x8x128xf32, #tpu.memory_space<vmem>>, vector<1x8x128xf32>,
    %c5_i32 = arith.constant 5 : i32
    %190 = arith.index_cast %c5_i32 : i32 to index
    %c0_57 = arith.constant 0 : index
    %c0_58 = arith.constant 0 : index
    %191 = vector.load %arg8[%190, %c0_57, %c0_58] : memref<8x8x512xf32, #tpu.memory_space<vmem>>, vector<1x8x512xf32>
    %192 = vector.shape_cast %191 : vector<1x8x512xf32> to vector<8x512xf32>
    %193 = arith.truncf %185 : vector<8x128xf32> to vector<8x128xbf16>
    %cst_59 = arith.constant dense<0.000000e+00> : vector<8x512xf32>
    %194 = tpu.matmul %193, %12, %cst_59 {dimension_numbers = #tpu.dot_dimension_numbers<[1], [0], [0], [1], [0, 0, 1, 1], [], []>} : vector<8x128xbf16>, vector<128x512xbf16>, vector<8x512xf32> -> vector<8x512xf32>
    %195 = arith.addf %192, %194 : vector<8x512xf32>
    %196 = vector.extract_strided_slice %195 {offsets = [0, 0], sizes = [8, 128], strides = [1, 1]} : vector<8x512xf32> to vector<8x128xf32>
    %197 = arith.negf %196 : vector<8x128xf32>
    %198 = math.exp %197 : vector<8x128xf32>
    %cst_60 = arith.constant 1.000000e+00 : f32
    %199 = vector.broadcast %cst_60 : f32 to vector<8x128xf32>
    %200 = arith.addf %199, %198 : vector<8x128xf32>
    %201 = arith.divf %199, %200 : vector<8x128xf32>
    %202 = vector.extract_strided_slice %195 {offsets = [0, 128], sizes = [8, 128], strides = [1, 1]} : vector<8x512xf32> to vector<8x128xf32>
    %203 = arith.negf %202 : vector<8x128xf32>
    %204 = math.exp %203 : vector<8x128xf32>
    %cst_61 = arith.constant 1.000000e+00 : f32
    %205 = vector.broadcast %cst_61 : f32 to vector<8x128xf32>
    %206 = arith.addf %205, %204 : vector<8x128xf32>
    %207 = arith.divf %205, %206 : vector<8x128xf32>
    %208 = vector.extract_strided_slice %195 {offsets = [0, 256], sizes = [8, 128], strides = [1, 1]} : vector<8x512xf32> to vector<8x128xf32>
    %209 = math.tanh %208 : vector<8x128xf32>
    %210 = vector.extract_strided_slice %195 {offsets = [0, 384], sizes = [8, 128], strides = [1, 1]} : vector<8x512xf32> to vector<8x128xf32>
    %211 = arith.negf %210 : vector<8x128xf32>
    %212 = math.exp %211 : vector<8x128xf32>
    %cst_62 = arith.constant 1.000000e+00 : f32
    %213 = vector.broadcast %cst_62 : f32 to vector<8x128xf32>
    %214 = arith.addf %213, %212 : vector<8x128xf32>
    %215 = arith.divf %213, %214 : vector<8x128xf32>
    %216 = arith.mulf %207, %183 : vector<8x128xf32>
    %217 = arith.mulf %201, %209 : vector<8x128xf32>
    %218 = arith.addf %216, %217 : vector<8x128xf32>
    %219 = math.tanh %218 : vector<8x128xf32>
    %220 = arith.mulf %215, %219 : vector<8x128xf32>
    %221 = arith.index_cast %c5_i32 : i32 to index
    %c0_63 = arith.constant 0 : index
    %c0_64 = arith.constant 0 : index
    %222 = vector.load %arg9[%221, %c0_63, %c0_64] : memref<8x8x128xf32, #tpu.memory_space<vmem>>, vector<1x8x128xf32>
    %223 = vector.shape_cast %222 : vector<1x8x128xf32> to vector<8x128xf32>
    %224 = vector.shape_cast %220 : vector<8x128xf32> to vector<1x8x128xf32>
    tpu.vector_store %arg9[%221, %c0_63, %c0_64], %224 {strides = array<i32>} : memref<8x8x128xf32, #tpu.memory_space<vmem>>, vector<1x8x128xf32>,
    %c6_i32 = arith.constant 6 : i32
    %225 = arith.index_cast %c6_i32 : i32 to index
    %c0_65 = arith.constant 0 : index
    %c0_66 = arith.constant 0 : index
    %226 = vector.load %arg8[%225, %c0_65, %c0_66] : memref<8x8x512xf32, #tpu.memory_space<vmem>>, vector<1x8x512xf32>
    %227 = vector.shape_cast %226 : vector<1x8x512xf32> to vector<8x512xf32>
    %228 = arith.truncf %220 : vector<8x128xf32> to vector<8x128xbf16>
    %cst_67 = arith.constant dense<0.000000e+00> : vector<8x512xf32>
    %229 = tpu.matmul %228, %12, %cst_67 {dimension_numbers = #tpu.dot_dimension_numbers<[1], [0], [0], [1], [0, 0, 1, 1], [], []>} : vector<8x128xbf16>, vector<128x512xbf16>, vector<8x512xf32> -> vector<8x512xf32>
    %230 = arith.addf %227, %229 : vector<8x512xf32>
    %231 = vector.extract_strided_slice %230 {offsets = [0, 0], sizes = [8, 128], strides = [1, 1]} : vector<8x512xf32> to vector<8x128xf32>
    %232 = arith.negf %231 : vector<8x128xf32>
    %233 = math.exp %232 : vector<8x128xf32>
    %cst_68 = arith.constant 1.000000e+00 : f32
    %234 = vector.broadcast %cst_68 : f32 to vector<8x128xf32>
    %235 = arith.addf %234, %233 : vector<8x128xf32>
    %236 = arith.divf %234, %235 : vector<8x128xf32>
    %237 = vector.extract_strided_slice %230 {offsets = [0, 128], sizes = [8, 128], strides = [1, 1]} : vector<8x512xf32> to vector<8x128xf32>
    %238 = arith.negf %237 : vector<8x128xf32>
    %239 = math.exp %238 : vector<8x128xf32>
    %cst_69 = arith.constant 1.000000e+00 : f32
    %240 = vector.broadcast %cst_69 : f32 to vector<8x128xf32>
    %241 = arith.addf %240, %239 : vector<8x128xf32>
    %242 = arith.divf %240, %241 : vector<8x128xf32>
    %243 = vector.extract_strided_slice %230 {offsets = [0, 256], sizes = [8, 128], strides = [1, 1]} : vector<8x512xf32> to vector<8x128xf32>
    %244 = math.tanh %243 : vector<8x128xf32>
    %245 = vector.extract_strided_slice %230 {offsets = [0, 384], sizes = [8, 128], strides = [1, 1]} : vector<8x512xf32> to vector<8x128xf32>
    %246 = arith.negf %245 : vector<8x128xf32>
    %247 = math.exp %246 : vector<8x128xf32>
    %cst_70 = arith.constant 1.000000e+00 : f32
    %248 = vector.broadcast %cst_70 : f32 to vector<8x128xf32>
    %249 = arith.addf %248, %247 : vector<8x128xf32>
    %250 = arith.divf %248, %249 : vector<8x128xf32>
    %251 = arith.mulf %242, %218 : vector<8x128xf32>
    %252 = arith.mulf %236, %244 : vector<8x128xf32>
    %253 = arith.addf %251, %252 : vector<8x128xf32>
    %254 = math.tanh %253 : vector<8x128xf32>
    %255 = arith.mulf %250, %254 : vector<8x128xf32>
    %256 = arith.index_cast %c6_i32 : i32 to index
    %c0_71 = arith.constant 0 : index
    %c0_72 = arith.constant 0 : index
    %257 = vector.load %arg9[%256, %c0_71, %c0_72] : memref<8x8x128xf32, #tpu.memory_space<vmem>>, vector<1x8x128xf32>
    %258 = vector.shape_cast %257 : vector<1x8x128xf32> to vector<8x128xf32>
    %259 = vector.shape_cast %255 : vector<8x128xf32> to vector<1x8x128xf32>
    tpu.vector_store %arg9[%256, %c0_71, %c0_72], %259 {strides = array<i32>} : memref<8x8x128xf32, #tpu.memory_space<vmem>>, vector<1x8x128xf32>,
    %c7_i32 = arith.constant 7 : i32
    %260 = arith.index_cast %c7_i32 : i32 to index
    %c0_73 = arith.constant 0 : index
    %c0_74 = arith.constant 0 : index
    %261 = vector.load %arg8[%260, %c0_73, %c0_74] : memref<8x8x512xf32, #tpu.memory_space<vmem>>, vector<1x8x512xf32>
    %262 = vector.shape_cast %261 : vector<1x8x512xf32> to vector<8x512xf32>
    %263 = arith.truncf %255 : vector<8x128xf32> to vector<8x128xbf16>
    %cst_75 = arith.constant dense<0.000000e+00> : vector<8x512xf32>
    %264 = tpu.matmul %263, %12, %cst_75 {dimension_numbers = #tpu.dot_dimension_numbers<[1], [0], [0], [1], [0, 0, 1, 1], [], []>} : vector<8x128xbf16>, vector<128x512xbf16>, vector<8x512xf32> -> vector<8x512xf32>
    %265 = arith.addf %262, %264 : vector<8x512xf32>
    %266 = vector.extract_strided_slice %265 {offsets = [0, 0], sizes = [8, 128], strides = [1, 1]} : vector<8x512xf32> to vector<8x128xf32>
    %267 = arith.negf %266 : vector<8x128xf32>
    %268 = math.exp %267 : vector<8x128xf32>
    %cst_76 = arith.constant 1.000000e+00 : f32
    %269 = vector.broadcast %cst_76 : f32 to vector<8x128xf32>
    %270 = arith.addf %269, %268 : vector<8x128xf32>
    %271 = arith.divf %269, %270 : vector<8x128xf32>
    %272 = vector.extract_strided_slice %265 {offsets = [0, 128], sizes = [8, 128], strides = [1, 1]} : vector<8x512xf32> to vector<8x128xf32>
    %273 = arith.negf %272 : vector<8x128xf32>
    %274 = math.exp %273 : vector<8x128xf32>
    %cst_77 = arith.constant 1.000000e+00 : f32
    %275 = vector.broadcast %cst_77 : f32 to vector<8x128xf32>
    %276 = arith.addf %275, %274 : vector<8x128xf32>
    %277 = arith.divf %275, %276 : vector<8x128xf32>
    %278 = vector.extract_strided_slice %265 {offsets = [0, 256], sizes = [8, 128], strides = [1, 1]} : vector<8x512xf32> to vector<8x128xf32>
    %279 = math.tanh %278 : vector<8x128xf32>
    %280 = vector.extract_strided_slice %265 {offsets = [0, 384], sizes = [8, 128], strides = [1, 1]} : vector<8x512xf32> to vector<8x128xf32>
    %281 = arith.negf %280 : vector<8x128xf32>
    %282 = math.exp %281 : vector<8x128xf32>
    %cst_78 = arith.constant 1.000000e+00 : f32
    %283 = vector.broadcast %cst_78 : f32 to vector<8x128xf32>
    %284 = arith.addf %283, %282 : vector<8x128xf32>
    %285 = arith.divf %283, %284 : vector<8x128xf32>
    %286 = arith.mulf %277, %253 : vector<8x128xf32>
    %287 = arith.mulf %271, %279 : vector<8x128xf32>
    %288 = arith.addf %286, %287 : vector<8x128xf32>
    %289 = math.tanh %288 : vector<8x128xf32>
    %290 = arith.mulf %285, %289 : vector<8x128xf32>
    %291 = arith.index_cast %c7_i32 : i32 to index
    %c0_79 = arith.constant 0 : index
    %c0_80 = arith.constant 0 : index
    %292 = vector.load %arg9[%291, %c0_79, %c0_80] : memref<8x8x128xf32, #tpu.memory_space<vmem>>, vector<1x8x128xf32>
    %293 = vector.shape_cast %292 : vector<1x8x128xf32> to vector<8x128xf32>
    %294 = vector.shape_cast %290 : vector<8x128xf32> to vector<1x8x128xf32>
    tpu.vector_store %arg9[%291, %c0_79, %c0_80], %294 {strides = array<i32>} : memref<8x8x128xf32, #tpu.memory_space<vmem>>, vector<1x8x128xf32>,
    %c8_i32 = arith.constant 8 : i32
    %c0_81 = arith.constant 0 : index
    %c0_82 = arith.constant 0 : index
    %295 = vector.load %arg10[%c0_81, %c0_82] : memref<8x128xf32, #tpu.memory_space<vmem>>, vector<8x128xf32>
    tpu.vector_store %arg10[%c0_81, %c0_82], %290 {strides = array<i32>} : memref<8x128xf32, #tpu.memory_space<vmem>>, vector<8x128xf32>,
    %c0_83 = arith.constant 0 : index
    %c0_84 = arith.constant 0 : index
    %296 = vector.load %arg11[%c0_83, %c0_84] : memref<8x128xf32, #tpu.memory_space<vmem>>, vector<8x128xf32>
    tpu.vector_store %arg11[%c0_83, %c0_84], %288 {strides = array<i32>} : memref<8x128xf32, #tpu.memory_space<vmem>>, vector<8x128xf32>,
    %c0_85 = arith.constant 0 : index
    %c0_86 = arith.constant 0 : index
    %c0_87 = arith.constant 0 : index
    %297 = vector.load %arg9[%c0_85, %c0_86, %c0_87] : memref<8x8x128xf32, #tpu.memory_space<vmem>>, vector<8x8x128xf32>
    %298 = vector.shape_cast %297 : vector<8x8x128xf32> to vector<64x128xf32>
    %cst_88 = arith.constant 0.000000e+00 : f32
    %299 = vector.broadcast %cst_88 : f32 to vector<64x128xf32>
    %300 = arith.maximumf %298, %299 : vector<64x128xf32>
    %301 = arith.truncf %300 : vector<64x128xf32> to vector<64x128xbf16>
    %c0_89 = arith.constant 0 : index
    %c0_90 = arith.constant 0 : index
    %302 = vector.load %arg5[%c0_89, %c0_90] : memref<128x128xbf16, #tpu.memory_space<vmem>>, vector<128x128xbf16>
    %cst_91 = arith.constant dense<0.000000e+00> : vector<64x128xf32>
    %303 = tpu.matmul %301, %302, %cst_91 {dimension_numbers = #tpu.dot_dimension_numbers<[1], [0], [0], [1], [0, 0, 1, 1], [], []>} : vector<64x128xbf16>, vector<128x128xbf16>, vector<64x128xf32> -> vector<64x128xf32>
    %c0_92 = arith.constant 0 : index
    %c0_93 = arith.constant 0 : index
    %304 = vector.load %arg6[%c0_92, %c0_93] : memref<1x128xf32, #tpu.memory_space<vmem>>, vector<1x128xf32>
    %305 = vector.broadcast %304 : vector<1x128xf32> to vector<64x128xf32>
    %306 = arith.addf %303, %305 : vector<64x128xf32>
    %cst_94 = arith.constant dense<0xFF800000> : vector<64xf32>
    %307 = vector.multi_reduction <maximumf>, %306, %cst_94 [1] : vector<64x128xf32> to vector<64xf32>
    %308 = vector.shape_cast %307 : vector<64xf32> to vector<64x1xf32>
    %309 = vector.broadcast %308 : vector<64x1xf32> to vector<64x128xf32>
    %310 = arith.subf %306, %309 : vector<64x128xf32>
    %311 = math.exp %310 : vector<64x128xf32>
    %cst_95 = arith.constant dense<0.000000e+00> : vector<64xf32>
    %312 = vector.multi_reduction <add>, %311, %cst_95 [1] : vector<64x128xf32> to vector<64xf32>
    %313 = vector.shape_cast %312 : vector<64xf32> to vector<64x1xf32>
    %314 = math.log %313 : vector<64x1xf32>
    %315 = vector.broadcast %314 : vector<64x1xf32> to vector<64x128xf32>
    %316 = arith.subf %310, %315 : vector<64x128xf32>
    %317 = vector.shape_cast %316 : vector<64x128xf32> to vector<8x8x128xf32>
    %c0_96 = arith.constant 0 : index
    %c0_97 = arith.constant 0 : index
    %c0_98 = arith.constant 0 : index
    %318 = vector.load %arg7[%c0_96, %c0_97, %c0_98] : memref<8x8x128xf32, #tpu.memory_space<vmem>>, vector<8x8x128xf32>
    tpu.vector_store %arg7[%c0_96, %c0_97, %c0_98], %317 {strides = array<i32>} : memref<8x8x128xf32, #tpu.memory_space<vmem>>, vector<8x8x128xf32>,
    return
  }
  func.func @transform_0(%arg0: i32) -> (i32, i32, i32) {
    %c0_i32 = arith.constant 0 : i32
    %c0_i32_0 = arith.constant 0 : i32
    %c0_i32_1 = arith.constant 0 : i32
    return %arg0, %c0_i32, %c0_i32_0 : i32, i32, i32
  }
  func.func @transform_1(%arg0: i32) -> (i32, i32) {
    %c0_i32 = arith.constant 0 : i32
    %c0_i32_0 = arith.constant 0 : i32
    %c0_i32_1 = arith.constant 0 : i32
    return %c0_i32, %c0_i32_0 : i32, i32
  }
  func.func @transform_2(%arg0: i32) -> (i32, i32) {
    %c0_i32 = arith.constant 0 : i32
    %c0_i32_0 = arith.constant 0 : i32
    %c0_i32_1 = arith.constant 0 : i32
    return %c0_i32, %c0_i32_0 : i32, i32
  }
  func.func @transform_3(%arg0: i32) -> (i32, i32) {
    %c0_i32 = arith.constant 0 : i32
    %c0_i32_0 = arith.constant 0 : i32
    %c0_i32_1 = arith.constant 0 : i32
    return %c0_i32, %c0_i32_0 : i32, i32
  }
  func.func @transform_4(%arg0: i32) -> (i32, i32) {
    %c0_i32 = arith.constant 0 : i32
    %c0_i32_0 = arith.constant 0 : i32
    %c0_i32_1 = arith.constant 0 : i32
    return %c0_i32, %c0_i32_0 : i32, i32
  }
  func.func @transform_5(%arg0: i32) -> (i32, i32) {
    %c0_i32 = arith.constant 0 : i32
    %c0_i32_0 = arith.constant 0 : i32
    %c0_i32_1 = arith.constant 0 : i32
    return %c0_i32, %c0_i32_0 : i32, i32
  }
  func.func @transform_6(%arg0: i32) -> (i32, i32, i32) {
    %c0_i32 = arith.constant 0 : i32
    %c0_i32_0 = arith.constant 0 : i32
    %c0_i32_1 = arith.constant 0 : i32
    return %arg0, %c0_i32, %c0_i32_0 : i32, i32, i32
  }
}

</mosaic_0001>

<bundles_post_ra>
// kernel: my_lstm_forward.1
= control target key start
LH: loop header
LB: loop body
LE: loop exit
PB: predicated region body
PF: predicated region fallthrough
CT: control target
= control target key end

     0   :  { %11 = vsyncpa [#allocation7], 0  ;;  %s2993_s0 = inlined_call_operand.vmem [shape: bf16[8,8,128], index: 0, kind: input, shape index: {}]   ;;  %s2994_s1 = inlined_call_operand.hbm [shape: bf16[128,512], index: 1, kind: input, shape index: {}]   ;;  %s2995_s2 = inlined_call_operand.hbm [shape: bf16[128,512], index: 2, kind: input, shape index: {}]   ;;  %s2996_s3 = inlined_call_operand.vmem [shape: f32[1,512], index: 3, kind: input, shape index: {}]   ;;  %s2997_s4 = inlined_call_operand.vmem [shape: bf16[128,128], index: 4, kind: input, shape index: {}]   ;;  %s2998_s5 = inlined_call_operand.vmem [shape: f32[1,128], index: 5, kind: input, shape index: {}]   ;;  %s2999_s6 = inlined_call_operand.vmem [shape: f32[8,8,128], index: 6, kind: output, shape index: {}]  }
   0x1   :  { %12 = vsyncpa [#allocation9], 0  ;;  %s2357_s21 = smov [#allocation6]  }
   0x2   :  { %s20_s22 = sshll.u32 %s2357_s21, 4  ;;  %s21_s22 = int_to_ptr.vmem [resolvable:$true] %s20_s22 }
   0x3   :  { %s2321_s23 = scalar_lea.vmem %s21_s22, 4096  ;;  %p2326_p1 = scmp.lt.s32.totalorder %s21_s22, %s21_s22 }
   0x4   :  { %p2322_p0 = scmp.ne.s32.totalorder %s21_s22, %s2321_s23  ;;  %p2327_p2 = scmp.lt.s32.totalorder %s2321_s23, %s2321_s23 }
   0x6   :  { %p2328_p3 = por %p2327_p2, %p2326_p1 }
   0x8   :  { %p2329_p4 = pnand %p2328_p3, %p2322_p0 }
   0xa   :  { %2332 = shalt.err (!%p2329_p4)
}
   0xb   :  { %s2358_s24 = smov 256   ;;  %s2359_s25 = smov 16  }
   0xc   :  { %26 = dma.hbm_to_vmem [thread:$0]  %s2994_s1, 4096, %s21_s22, [#allocation7], %s2358_s24, %s2358_s24, %s2359_s25  }
   0xd   :  { %s2360_s28 = smov [#allocation8]  }
   0xe   :  { %s32_s29 = sshll.u32 %s2360_s28, 4  ;;  %s33_s29 = int_to_ptr.vmem [resolvable:$true] %s32_s29 }
   0xf   :  { %s2341_s30 = scalar_lea.vmem %s33_s29, 4096  ;;  %p2346_p6 = scmp.lt.s32.totalorder %s33_s29, %s33_s29 }
  0x10   :  { %p2342_p5 = scmp.ne.s32.totalorder %s33_s29, %s2341_s30  ;;  %p2347_p7 = scmp.lt.s32.totalorder %s2341_s30, %s2341_s30 }
  0x12   :  { %p2348_p8 = por %p2347_p7, %p2346_p6 }
  0x14   :  { %p2349_p9 = pnand %p2348_p8, %p2342_p5 }
  0x16   :  { %2352 = shalt.err (!%p2349_p9)
}
  0x17   :  { %38 = dma.hbm_to_vmem [thread:$0]  %s2995_s2, 4096, %s33_s29, [#allocation9], %s2358_s24, %s2358_s24, %s2359_s25  }
  0x18   :  { %2353 = dma.done.wait [#allocation7], 4096  }
  0x19   :  { %2354 = vsyncadd [#allocation7], 4294963200 }
  0x1a   :  { %2355 = dma.done.wait [#allocation9], 4096  }
  0x1b   :  { %2356 = vsyncadd [#allocation9], 4294963200  ;;  %v3000_v0 = vmov 0   ;;  %v2013_v1 = vld [vmem:[#allocation6 + $0xe4] ss:$16 sps:$4 sm:$0xff]   ;;  %v2362_v38 = vmov 0.0|0.0  }
  0x1c   :  { %336 = vmatprep.mubr.bf16.mxu1 %v3000_v0  ;;  %713 = vmatprep.mubr.bf16.mxu0 %v3000_v0  ;;  %v2015_v2 = vld [vmem:[#allocation6 + $0xe0] ss:$16 sps:$4 sm:$0xff]   ;;  %v2406_v3 = vld [vmem:[#allocation8 + $0xe4] ss:$16 sps:$4 sm:$0xff]   ;;  %v2064_v32 = vld [vmem:[#allocation6 + $0xec] ss:$16 sps:$4 sm:$0xff]  }
  0x1d   :  { %304 = vmatprep.subr.bf16.mxu1 %v2013_v1  ;;  %v2408_v4 = vld [vmem:[#allocation8 + $0xe0] ss:$16 sps:$4 sm:$0xff]   ;;  %v2019_v5 = vld [vmem:[#allocation6 + $0xc4] ss:$16 sps:$4 sm:$0xff]   ;;  %681 = vmatprep.subr.bf16.mxu0 %v2406_v3  ;;  %v2062_v35 = vld [vmem:[#allocation6 + $0xe8] ss:$16 sps:$4 sm:$0xff]  }
  0x1e   :  { %305 = vmatpush1.bf16.msra.mxu1 %v2015_v2  ;;  %v2021_v6 = vld [vmem:[#allocation6 + $0xc0] ss:$16 sps:$4 sm:$0xff]   ;;  %v2411_v7 = vld [vmem:[#allocation8 + $0xc4] ss:$16 sps:$4 sm:$0xff]   ;;  %682 = vmatpush1.bf16.msra.mxu0 %v2408_v4  ;;  %v2067_v36 = vld [vmem:[#allocation6 + $0xcc] ss:$16 sps:$4 sm:$0xff]  }
  0x1f   :  { %306 = vmatprep.subr.bf16.mxu1 %v2019_v5  ;;  %v2414_v8 = vld [vmem:[#allocation8 + $0xc0] ss:$16 sps:$4 sm:$0xff]   ;;  %683 = vmatprep.subr.bf16.mxu0 %v2411_v7  ;;  %v2025_v9 = vld [vmem:[#allocation6 + $0xa4] ss:$16 sps:$4 sm:$0xff]   ;;  %v2065_v37 = vld [vmem:[#allocation6 + $0xc8] ss:$16 sps:$4 sm:$0xff]  }
  0x20   :  { %v2027_v10 = vld [vmem:[#allocation6 + $0xa0] ss:$16 sps:$4 sm:$0xff]   ;;  %v2417_v11 = vld [vmem:[#allocation8 + $0xa4] ss:$16 sps:$4 sm:$0xff]   ;;  %v2071_v39 = vld [vmem:[#allocation6 + $0xac] ss:$16 sps:$4 sm:$0xff]  }
  0x21   :  { %v2031_v12 = vld [vmem:[#allocation6 + $0x84] ss:$16 sps:$4 sm:$0xff]   ;;  %v2420_v13 = vld [vmem:[#allocation8 + $0xa0] ss:$16 sps:$4 sm:$0xff]   ;;  %v2068_v40 = vld [vmem:[%s2993_s0 + $0x8] sm:$0xff]  }
  0x22   :  { %307 = vmatpush1.bf16.msra.mxu1 %v2021_v6  ;;  %684 = vmatpush1.bf16.msra.mxu0 %v2414_v8  ;;  %v2423_v14 = vld [vmem:[#allocation8 + $0x84] ss:$16 sps:$4 sm:$0xff]   ;;  %v2033_v15 = vld [vmem:[#allocation6 + $0x80] ss:$16 sps:$4 sm:$0xff]   ;;  %v2069_v41 = vld [vmem:[#allocation6 + $0xa8] ss:$16 sps:$4 sm:$0xff]  }
  0x23   :  { %308 = vmatprep.subr.bf16.mxu1 %v2025_v9  ;;  %685 = vmatprep.subr.bf16.mxu0 %v2417_v11  ;;  %v2037_v16 = vld [vmem:[#allocation6 + $0x64] ss:$16 sps:$4 sm:$0xff]   ;;  %v2426_v17 = vld [vmem:[#allocation8 + $0x80] ss:$16 sps:$4 sm:$0xff]   ;;  %v2074_v42 = vld [vmem:[#allocation6 + $0x8c] ss:$16 sps:$4 sm:$0xff]  }
  0x24   :  { %v2429_v18 = vld [vmem:[#allocation8 + $0x64] ss:$16 sps:$4 sm:$0xff]   ;;  %v2039_v19 = vld [vmem:[#allocation6 + $0x60] ss:$16 sps:$4 sm:$0xff]   ;;  %v2072_v43 = vld [vmem:[#allocation6 + $0x88] ss:$16 sps:$4 sm:$0xff]  }
  0x25   :  { %v2043_v20 = vld [vmem:[#allocation6 + $0x44] ss:$16 sps:$4 sm:$0xff]   ;;  %v2432_v21 = vld [vmem:[#allocation8 + $0x60] ss:$16 sps:$4 sm:$0xff]   ;;  %v2078_v44 = vld [vmem:[#allocation6 + $0x6c] ss:$16 sps:$4 sm:$0xff]  }
  0x26   :  { %309 = vmatpush1.bf16.msra.mxu1 %v2027_v10  ;;  %686 = vmatpush1.bf16.msra.mxu0 %v2420_v13  ;;  %v2435_v22 = vld [vmem:[#allocation8 + $0x44] ss:$16 sps:$4 sm:$0xff]   ;;  %v2045_v23 = vld [vmem:[#allocation6 + $0x40] ss:$16 sps:$4 sm:$0xff]   ;;  %v2076_v46 = vld [vmem:[#allocation6 + $0x68] ss:$16 sps:$4 sm:$0xff]  }
  0x27   :  { %310 = vmatprep.subr.bf16.mxu1 %v2031_v12  ;;  %687 = vmatprep.subr.bf16.mxu0 %v2423_v14  ;;  %v2049_v24 = vld [vmem:[#allocation6 + $0x24] ss:$16 sps:$4 sm:$0xff]   ;;  %v2438_v25 = vld [vmem:[#allocation8 + $0x40] ss:$16 sps:$4 sm:$0xff]   ;;  %v2081_v47 = vld [vmem:[#allocation6 + $0x4c] ss:$16 sps:$4 sm:$0xff]   ;;  %v100_v12 = vlaneseq }
  0x28   :  { %v2441_v26 = vld [vmem:[#allocation8 + $0x24] ss:$16 sps:$4 sm:$0xff]   ;;  %v2051_v27 = vld [vmem:[#allocation6 + $0x20] ss:$16 sps:$4 sm:$0xff]   ;;  %v2079_v48 = vld [vmem:[#allocation6 + $0x48] ss:$16 sps:$4 sm:$0xff]  }
  0x29   :  { %v2055_v28 = vld [vmem:[#allocation6 + $0x4] ss:$16 sps:$4 sm:$0xff]   ;;  %v2444_v29 = vld [vmem:[#allocation8 + $0x20] ss:$16 sps:$4 sm:$0xff]   ;;  %v2085_v49 = vld [vmem:[#allocation6 + $0x2c] ss:$16 sps:$4 sm:$0xff]  }
  0x2a   :  { %311 = vmatpush1.bf16.msra.mxu1 %v2033_v15  ;;  %688 = vmatpush1.bf16.msra.mxu0 %v2426_v17  ;;  %v2447_v30 = vld [vmem:[#allocation8 + $0x4] ss:$16 sps:$4 sm:$0xff]   ;;  %v2057_v31 = vld [vmem:[#allocation6] ss:$16 sps:$4 sm:$0xff]   ;;  %v2082_v50 = vld [vmem:[%s2993_s0 + $0x18] sm:$0xff]   ;;  %v101_v15 = vshrl.u32 %v100_v12, 7 }
  0x2b   :  { %312 = vmatprep.subr.bf16.mxu1 %v2037_v16  ;;  %689 = vmatprep.subr.bf16.mxu0 %v2429_v18  ;;  %v2450_v33 = vld [vmem:[#allocation8] ss:$16 sps:$4 sm:$0xff]   ;;  %v2083_v51 = vld [vmem:[#allocation6 + $0x28] ss:$16 sps:$4 sm:$0xff]   ;;  %v2088_v52 = vld [vmem:[#allocation6 + $0xc] ss:$16 sps:$4 sm:$0xff]  }
  0x2c   :  { %v2456_v34 = vld [vmem:[%s2993_s0] sm:$0xff]   ;;  %v2075_v45 = vld [vmem:[%s2993_s0 + $0x10] sm:$0xff]   ;;  %v2086_v53 = vld [vmem:[#allocation6 + $0x8] ss:$16 sps:$4 sm:$0xff]   ;;  %v102_v16 = vsub.s32 0, %v101_v15 }
  0x2d   :  { %v2488_v54 = vld [vmem:[#allocation8 + $0xec] ss:$16 sps:$4 sm:$0xff]   ;;  %v2492_v55 = vld [vmem:[#allocation8 + $0xe8] ss:$16 sps:$4 sm:$0xff]  }
  0x2e   :  { %313 = vmatpush1.bf16.msra.mxu1 %v2039_v19  ;;  %690 = vmatpush1.bf16.msra.mxu0 %v2432_v21  ;;  %v2495_v56 = vld [vmem:[#allocation8 + $0xcc] ss:$16 sps:$4 sm:$0xff]   ;;  %v2501_v57 = vld [vmem:[#allocation8 + $0xc8] ss:$16 sps:$4 sm:$0xff]   ;;  %v98_v19 = vld [vmem:[%s2996_s3] sm:$0xf] }
  0x2f   :  { %314 = vmatprep.subr.bf16.mxu1 %v2043_v20  ;;  %691 = vmatprep.subr.bf16.mxu0 %v2435_v22  ;;  %v2505_v58 = vld [vmem:[#allocation8 + $0xac] ss:$16 sps:$4 sm:$0xff]   ;;  %v2508_v59 = vld [vmem:[#allocation8 + $0xa8] ss:$16 sps:$4 sm:$0xff]  }
  0x30   :  { %v2511_v60 = vld [vmem:[#allocation8 + $0x8c] ss:$16 sps:$4 sm:$0xff]   ;;  %v2514_v61 = vld [vmem:[#allocation8 + $0x88] ss:$16 sps:$4 sm:$0xff]  }
  0x31   :  { %v2518_v62 = vld [vmem:[#allocation8 + $0x6c] ss:$16 sps:$4 sm:$0xff]   ;;  %v2521_v63 = vld [vmem:[#allocation8 + $0x68] ss:$16 sps:$4 sm:$0xff]  }
  0x32   :  { %315 = vmatpush1.bf16.msra.mxu1 %v2045_v23  ;;  %692 = vmatpush1.bf16.msra.mxu0 %v2438_v25  ;;  %v2524_v1 = vld [vmem:[#allocation8 + $0x4c] ss:$16 sps:$4 sm:$0xff]   ;;  %v2527_v2 = vld [vmem:[#allocation8 + $0x48] ss:$16 sps:$4 sm:$0xff]   ;;  %v106_v23 = vsub.s32 1, %v101_v15 }
  0x33   :  { %316 = vmatprep.subr.bf16.mxu1 %v2049_v24  ;;  %693 = vmatprep.subr.bf16.mxu0 %v2441_v26  ;;  %v2531_v5 = vld [vmem:[#allocation8 + $0x2c] ss:$16 sps:$4 sm:$0xff]   ;;  %v2534_v6 = vld [vmem:[#allocation8 + $0x28] ss:$16 sps:$4 sm:$0xff]  }
  0x34   :  { %v2537_v9 = vld [vmem:[#allocation8 + $0xc] ss:$16 sps:$4 sm:$0xff]   ;;  %v2540_v10 = vld [vmem:[#allocation8 + $0x8] ss:$16 sps:$4 sm:$0xff]  }
  0x36   :  { %317 = vmatpush1.bf16.msra.mxu1 %v2051_v27  ;;  %694 = vmatpush1.bf16.msra.mxu0 %v2444_v29 }
  0x37   :  { %318 = vmatprep.subr.bf16.mxu1 %v2055_v28  ;;  %695 = vmatprep.subr.bf16.mxu0 %v2447_v30  ;;  %v103_v28 = vrot.slane %v98_v19, %v102_v16 }
  0x3a   :  { %319 = vmatpush1.bf16.msra.mxu1 %v2057_v31  ;;  %696 = vmatpush1.bf16.msra.mxu0 %v2450_v33 }
  0x3b   :  { %377 = vmatprep.subr.bf16.mxu1 %v2064_v32  ;;  %798 = vmatprep.subr.bf16.mxu0 %v2406_v3 }
  0x3d   :  { %337 = vmatmul.mubr.bf16.vlgmr.msra.gmra.mxu1 %v2456_v34  ;;  %714 = vmatmul.mubr.bf16.vlgmr.msra.gmra.mxu0 %v2362_v38 }
  0x3e   :  { %378 = vmatpush1.bf16.msra.mxu1 %v2062_v35  ;;  %346 = vmatprep.mubr.bf16.mxu1 %v3000_v0 }
  0x3f   :  { %379 = vmatprep.subr.bf16.mxu1 %v2067_v36  ;;  %799 = vmatpush1.bf16.msra.mxu0 %v2408_v4 }
  0x40   :  { %830 = vmatprep.mubr.bf16.mxu0 %v3000_v0  ;;  %800 = vmatprep.subr.bf16.mxu0 %v2411_v7 }
  0x42   :  { %380 = vmatpush1.bf16.msra.mxu1 %v2065_v37 }
  0x43   :  { %381 = vmatprep.subr.bf16.mxu1 %v2071_v39  ;;  %801 = vmatpush1.bf16.msra.mxu0 %v2414_v8 }
  0x44   :  { %802 = vmatprep.subr.bf16.mxu0 %v2417_v11 }
  0x45   :  { %347 = vmatmul.mubr.bf16.gmra.mxu1 %v2068_v40 }
  0x46   :  { %382 = vmatpush1.bf16.msra.mxu1 %v2069_v41  ;;  %356 = vmatprep.mubr.bf16.mxu1 %v3000_v0 }
  0x47   :  { %383 = vmatprep.subr.bf16.mxu1 %v2074_v42  ;;  %803 = vmatpush1.bf16.msra.mxu0 %v2420_v13 }
  0x48   :  { %804 = vmatprep.subr.bf16.mxu0 %v2423_v14 }
  0x4a   :  { %384 = vmatpush1.bf16.msra.mxu1 %v2072_v43 }
  0x4b   :  { %385 = vmatprep.subr.bf16.mxu1 %v2078_v44  ;;  %805 = vmatpush1.bf16.msra.mxu0 %v2426_v17 }
  0x4c   :  { %806 = vmatprep.subr.bf16.mxu0 %v2429_v18 }
  0x4d   :  { %357 = vmatmul.mubr.bf16.gmra.mxu1 %v2075_v45 }
  0x4e   :  { %386 = vmatpush1.bf16.msra.mxu1 %v2076_v46  ;;  %366 = vmatprep.mubr.bf16.mxu1 %v3000_v0 }
  0x4f   :  { %387 = vmatprep.subr.bf16.mxu1 %v2081_v47  ;;  %807 = vmatpush1.bf16.msra.mxu0 %v2432_v21 }
  0x50   :  { %808 = vmatprep.subr.bf16.mxu0 %v2435_v22 }
  0x52   :  { %388 = vmatpush1.bf16.msra.mxu1 %v2079_v48 }
  0x53   :  { %389 = vmatprep.subr.bf16.mxu1 %v2085_v49  ;;  %809 = vmatpush1.bf16.msra.mxu0 %v2438_v25 }
  0x54   :  { %810 = vmatprep.subr.bf16.mxu0 %v2441_v26 }
  0x55   :  { %367 = vmatmul.mubr.bf16.gmra.mxu1 %v2082_v50 }
  0x56   :  { %390 = vmatpush1.bf16.msra.mxu1 %v2083_v51  ;;  %409 = vmatprep.mubr.bf16.mxu1 %v3000_v0 }
  0x57   :  { %391 = vmatprep.subr.bf16.mxu1 %v2088_v52  ;;  %811 = vmatpush1.bf16.msra.mxu0 %v2444_v29 }
  0x58   :  { %812 = vmatprep.subr.bf16.mxu0 %v2447_v30 }
  0x5a   :  { %392 = vmatpush1.bf16.msra.mxu1 %v2086_v53 }
  0x5b   :  { %722 = vmatprep.subr.bf16.mxu1 %v2488_v54  ;;  %813 = vmatpush1.bf16.msra.mxu0 %v2450_v33 }
  0x5c   :  { %916 = vmatprep.subr.bf16.mxu0 %v2406_v3 }
  0x5d   :  { %410 = vmatmul.mubr.bf16.vlgmr.msra.gmra.mxu1 %v2456_v34  ;;  %v107_v34 = vrot.slane %v98_v19, %v106_v23 }
  0x5e   :  { %723 = vmatpush1.bf16.msra.mxu1 %v2492_v55  ;;  %419 = vmatprep.mubr.bf16.mxu1 %v3000_v0 }
  0x5f   :  { %724 = vmatprep.subr.bf16.mxu1 %v2495_v56 }
  0x62   :  { %725 = vmatpush1.bf16.msra.mxu1 %v2501_v57 }
  0x63   :  { %726 = vmatprep.subr.bf16.mxu1 %v2505_v58 }
  0x65   :  { %420 = vmatmul.mubr.bf16.gmra.mxu1 %v2068_v40 }
  0x66   :  { %727 = vmatpush1.bf16.msra.mxu1 %v2508_v59  ;;  %429 = vmatprep.mubr.bf16.mxu1 %v3000_v0 }
  0x67   :  { %728 = vmatprep.subr.bf16.mxu1 %v2511_v60 }
  0x6a   :  { %729 = vmatpush1.bf16.msra.mxu1 %v2514_v61 }
  0x6b   :  { %730 = vmatprep.subr.bf16.mxu1 %v2518_v62 }
  0x6d   :  { %430 = vmatmul.mubr.bf16.gmra.mxu1 %v2075_v45 }
  0x6e   :  { %731 = vmatpush1.bf16.msra.mxu1 %v2521_v63  ;;  %439 = vmatprep.mubr.bf16.mxu1 %v3000_v0 }
  0x6f   :  { %732 = vmatprep.subr.bf16.mxu1 %v2524_v1 }
  0x72   :  { %733 = vmatpush1.bf16.msra.mxu1 %v2527_v2 }
  0x73   :  { %734 = vmatprep.subr.bf16.mxu1 %v2531_v5 }
  0x75   :  { %440 = vmatmul.mubr.bf16.gmra.mxu1 %v2082_v50 }
  0x76   :  { %735 = vmatpush1.bf16.msra.mxu1 %v2534_v6  ;;  %754 = vmatprep.mubr.bf16.mxu1 %v3000_v0 }
  0x77   :  { %736 = vmatprep.subr.bf16.mxu1 %v2537_v9 }
  0x7a   :  { %737 = vmatpush1.bf16.msra.mxu1 %v2540_v10 }
  0x7b   :  { %839 = vmatprep.subr.bf16.mxu1 %v2488_v54 }
  0x7d   :  { %755 = vmatmul.mubr.bf16.vlgmr.msra.gmra.mxu1 %v2362_v38 }
  0x7e   :  { %840 = vmatpush1.bf16.msra.mxu1 %v2492_v55  ;;  %871 = vmatprep.mubr.bf16.mxu1 %v3000_v0 }
  0x7f   :  { %841 = vmatprep.subr.bf16.mxu1 %v2495_v56 }
  0x82   :  { %842 = vmatpush1.bf16.msra.mxu1 %v2501_v57 }
  0x83   :  { %843 = vmatprep.subr.bf16.mxu1 %v2505_v58 }
  0x86   :  { %844 = vmatpush1.bf16.msra.mxu1 %v2508_v59 }
  0x87   :  { %845 = vmatprep.subr.bf16.mxu1 %v2511_v60 }
  0x8a   :  { %846 = vmatpush1.bf16.msra.mxu1 %v2514_v61 }
  0x8b   :  { %847 = vmatprep.subr.bf16.mxu1 %v2518_v62 }
  0x8e   :  { %848 = vmatpush1.bf16.msra.mxu1 %v2521_v63 }
  0x8f   :  { %849 = vmatprep.subr.bf16.mxu1 %v2524_v1 }
  0x92   :  { %850 = vmatpush1.bf16.msra.mxu1 %v2527_v2 }
  0x93   :  { %851 = vmatprep.subr.bf16.mxu1 %v2531_v5 }
  0x96   :  { %852 = vmatpush1.bf16.msra.mxu1 %v2534_v6 }
  0x97   :  { %853 = vmatprep.subr.bf16.mxu1 %v2537_v9 }
  0x9a   :  { %854 = vmatpush1.bf16.msra.mxu1 %v2540_v10 }
  0x9b   :  { %957 = vmatprep.subr.bf16.mxu1 %v2488_v54 }
  0xfd   :  { %v338_v20 = vpop.f32.mrf.mxu1  ;;  %v715_v27 = vpop.f32.mrf.mxu0 }
  0xfe   :  { %v339_v0 = vadd.f32 %v338_v20, %v103_v28 }
  0xff   :  { %v340_v24 = vpop.f32.mrf.mxu1  ;;  %v717_v32 = vpop.f32.mrf.mxu0 }
 0x101   :  { %v342_v31 = vpop.f32.mrf.mxu1  ;;  %v719_v37 = vpop.f32.mrf.mxu0 }
 0x102   :  { %v2567_v35 = vadd.f32 %v342_v31, %v103_v28 }
 0x103   :  { %v344_v36 = vpop.f32.mrf.mxu1  ;;  %v720_v40 = vpop.f32.mrf.mxu0 }
 0x104   :  { %v2569_v38 = vadd.f32 %v344_v36, %v107_v34 }
 0x105   :  { %v348_v39 = vpop.f32.mrf.mxu1 }
 0x106   :  { %v2571_v41 = vadd.f32 %v348_v39, %v103_v28 }
 0x107   :  { %v350_v42 = vpop.f32.mrf.mxu1 }
 0x108   :  { %v2573_v43 = vadd.f32 %v350_v42, %v107_v34 }
 0x109   :  { %v352_v44 = vpop.f32.mrf.mxu1 }
 0x10a   :  { %v2575_v45 = vadd.f32 %v352_v44, %v103_v28 }
 0x10b   :  { %v354_v46 = vpop.f32.mrf.mxu1 }
 0x10c   :  { %v2577_v47 = vadd.f32 %v354_v46, %v107_v34  ;;  %v110_v46 = vsub.s32 2, %v101_v15 }
 0x10d   :  { %v358_v48 = vpop.f32.mrf.mxu1 }
 0x10e   :  { %3002 = vst [vmem:[#allocation12_spill] sm:$0xff] %v2577_v47  ;;  %v2579_v49 = vadd.f32 %v358_v48, %v103_v28 }
 0x10f   :  { %v360_v50 = vpop.f32.mrf.mxu1 }
 0x110   :  { %3003 = vst [vmem:[#allocation13_spill] sm:$0xff] %v2579_v49  ;;  %v2581_v51 = vadd.f32 %v360_v50, %v107_v34  ;;  %v341_v50 = vadd.f32 %v340_v24, %v107_v34 }
 0x111   :  { %v362_v52 = vpop.f32.mrf.mxu1 }
 0x112   :  { %3004 = vst [vmem:[#allocation14_spill] sm:$0xff] %v2581_v51  ;;  %v2583_v53 = vadd.f32 %v362_v52, %v103_v28  ;;  %v114_v52 = vsub.s32 3, %v101_v15  ;;  %v764_v51 = vadd.f32 %v717_v32, %v341_v50 }
 0x113   :  { %v364_v12 = vpop.f32.mrf.mxu1 }
 0x114   :  { %3005 = vst [vmem:[#allocation15_spill] sm:$0xff] %v2583_v53  ;;  %v2585_v16 = vadd.f32 %v364_v12, %v107_v34  ;;  %v111_v12 = vrot.slane %v98_v19, %v110_v46 }
 0x115   :  { %v368_v23 = vpop.f32.mrf.mxu1 }
 0x116   :  { %3006 = vst [vmem:[#allocation16_spill] sm:$0xff] %v2585_v16  ;;  %v2587_v31 = vadd.f32 %v368_v23, %v103_v28  ;;  %v115_v23 = vrot.slane %v98_v19, %v114_v52 }
 0x117   :  { %v370_v36 = vpop.f32.mrf.mxu1 }
 0x118   :  { %3007 = vst [vmem:[#allocation17_spill] sm:$0xff] %v2587_v31  ;;  %v2589_v37 = vadd.f32 %v370_v36, %v107_v34  ;;  %v763_v36 = vadd.f32 %v715_v27, %v339_v0 }
 0x119   :  { %v372_v39 = vpop.f32.mrf.mxu1 }
 0x11a   :  { %3008 = vst [vmem:[#allocation18_spill] sm:$0xff] %v2589_v37  ;;  %v2591_v40 = vadd.f32 %v372_v39, %v103_v28 }
 0x11b   :  { %v374_v42 = vpop.f32.mrf.mxu1 }
 0x11c   :  { %3009 = vst [vmem:[#allocation19_spill] sm:$0xff] %v2591_v40  ;;  %v2593_v44 = vadd.f32 %v374_v42, %v107_v34  ;;  %v1939_v40 = vmul.f32 -1.442695, %v764_v51 }
 0x11d   :  { %v411_v48 = vpop.f32.mrf.mxu1 }
 0x11e   :  { %3010 = vst [vmem:[#allocation20_spill] sm:$0xff] %v2593_v44  ;;  %v1938_v44 = vmul.f32 -1.442695, %v763_v36  ;;  %2121 = vpow2.f32 %v1939_v40 }
 0x11f   :  { %v413_v53 = vpop.f32.mrf.mxu1 }
 0x120   :  { %2123 = vpow2.f32 %v1938_v44 }
 0x121   :  { %v415_v16 = vpop.f32.mrf.mxu1 }
 0x122   :  { %v2595_v31 = vadd.f32 %v415_v16, %v111_v12 }
 0x123   :  { %v417_v37 = vpop.f32.mrf.mxu1 }
 0x124   :  { %v2597_v49 = vadd.f32 %v417_v37, %v115_v23 }
 0x125   :  { %v421_v39 = vpop.f32.mrf.mxu1 }
 0x126   :  { %v2599_v42 = vadd.f32 %v421_v39, %v111_v12 }
 0x127   :  { %v423_v47 = vpop.f32.mrf.mxu1 }
 0x128   :  { %v2601_v24 = vadd.f32 %v423_v47, %v115_v23 }
 0x129   :  { %v425_v15 = vpop.f32.mrf.mxu1 }
 0x12a   :  { %v2603_v20 = vadd.f32 %v425_v15, %v111_v12 }
 0x12b   :  { %v427_v19 = vpop.f32.mrf.mxu1  ;;  %v2122_v50 = vpop.eup %2121 }
 0x12c   :  { %3011 = vst [vmem:[#allocation21_spill] sm:$0xff] %v2603_v20  ;;  %v2605_v28 = vadd.f32 %v427_v19, %v115_v23  ;;  %v776_v15 = vadd.f32 1.0, %v2122_v50 }
 0x12d   :  { %v431_v0 = vpop.f32.mrf.mxu1  ;;  %v2124_v52 = vpop.eup %2123 }
 0x12e   :  { %v2607_v27 = vadd.f32 %v431_v0, %v111_v12  ;;  %v770_v0 = vadd.f32 1.0, %v2124_v52  ;;  %2125 = vrcp.f32 %v776_v15 }
 0x12f   :  { %v433_v32 = vpop.f32.mrf.mxu1 }
 0x130   :  { %3012 = vst [vmem:[#allocation22_spill] sm:$0xff] %v2607_v27  ;;  %v2609_v34 = vadd.f32 %v433_v32, %v115_v23  ;;  %v412_v27 = vadd.f32 %v411_v48, %v111_v12  ;;  %2127 = vrcp.f32 %v770_v0 }
 0x131   :  { %v435_v51 = vpop.f32.mrf.mxu1 }
 0x132   :  { %3013 = vst [vmem:[#allocation23_spill] sm:$0xff] %v2609_v34  ;;  %v2611_v16 = vadd.f32 %v435_v51, %v111_v12 }
 0x133   :  { %v437_v37 = vpop.f32.mrf.mxu1 }
 0x134   :  { %3014 = vst [vmem:[#allocation24_spill] sm:$0xff] %v2611_v16  ;;  %v2613_v47 = vadd.f32 %v437_v37, %v115_v23  ;;  %v414_v37 = vadd.f32 %v413_v53, %v115_v23 }
 0x135   :  { %v441_v46 = vpop.f32.mrf.mxu1 }
 0x136   :  { %3015 = vst [vmem:[#allocation25_spill] sm:$0xff] %v2613_v47  ;;  %v2615_v40 = vadd.f32 %v441_v46, %v111_v12 }
 0x137   :  { %v443_v44 = vpop.f32.mrf.mxu1 }
 0x138   :  { %3016 = vst [vmem:[#allocation26_spill] sm:$0xff] %v2615_v40  ;;  %v2617_v36 = vadd.f32 %v443_v44, %v115_v23 }
 0x139   :  { %v445_v39 = vpop.f32.mrf.mxu1 }
 0x13a   :  { %3017 = vst [vmem:[#allocation27_spill] sm:$0xff] %v2617_v36  ;;  %v2619_v19 = vadd.f32 %v445_v39, %v111_v12 }
 0x13b   :  { %v447_v32 = vpop.f32.mrf.mxu1  ;;  %v2126_v50 = vpop.eup %2125 }
 0x13c   :  { %3018 = vst [vmem:[#allocation28_spill] sm:$0xff] %v2619_v19  ;;  %v2621_v51 = vadd.f32 %v447_v32, %v115_v23  ;;  %v786_v52 = vmul.f32 0.0, %v2126_v50 }
 0x13d   :  { %v756_v16 = vpop.f32.mrf.mxu1  ;;  %v2128_v39 = vpop.eup %2127 }
 0x13e   :  { %v765_v47 = vadd.f32 %v756_v16, %v412_v27 }
 0x13f   :  { %v758_v46 = vpop.f32.mrf.mxu1 }
 0x140   :  { %2129 = vtanh.f32 %v765_v47  ;;  %v766_v40 = vadd.f32 %v758_v46, %v414_v37 }
 0x141   :  { %v760_v34 = vpop.f32.mrf.mxu1 }
 0x142   :  { %v1940_v44 = vmul.f32 -1.442695, %v766_v40 }
 0x143   :  { %v761_v36 = vpop.f32.mrf.mxu1 }
 0x144   :  { %2131 = vpow2.f32 %v1940_v44 }
 0x14d   :  { %v2130_v19 = vpop.eup %2129 }
 0x14e   :  { %v787_v20 = vmul.f32 %v2130_v19, %v2128_v39 }
 0x150   :  { %v2623_v48 = vadd.f32 %v787_v20, %v786_v52  ;;  %v3019_v20 = vmov 0  }
 0x151   :  { %v2132_v12 = vpop.eup %2131 }
 0x152   :  { %v783_v32 = vadd.f32 1.0, %v2132_v12  ;;  %2133 = vtanh.f32 %v2623_v48 }
 0x154   :  { %2135 = vrcp.f32 %v783_v32 }
 0x15f   :  { %v2134_v53 = vpop.eup %2133 }
 0x161   :  { %v2136_v23 = vpop.eup %2135 }
 0x162   :  { %v2626_v27 = vmul.f32 %v2136_v23, %v2134_v53 }
 0x164   :  { %v797_v34 = vpack.c.bf16 %v2626_v27, %v2626_v27 }
 0x166   :  { %831 = vmatmul.mubr.bf16.vlgmr.msra.gmra.mxu0 %v797_v34  ;;  %872 = vmatmul.mubr.bf16.vlgmr.msra.gmra.mxu1 %v797_v34 }
 0x167   :  { %917 = vmatpush1.bf16.msra.mxu0 %v2408_v4  ;;  %958 = vmatpush1.bf16.msra.mxu1 %v2492_v55 }
 0x168   :  { %918 = vmatprep.subr.bf16.mxu0 %v2411_v7  ;;  %959 = vmatprep.subr.bf16.mxu1 %v2495_v56 }
 0x169   :  { %948 = vmatprep.mubr.bf16.mxu0 %v3019_v20  ;;  %989 = vmatprep.mubr.bf16.mxu1 %v3019_v20 }
 0x16b   :  { %919 = vmatpush1.bf16.msra.mxu0 %v2414_v8  ;;  %960 = vmatpush1.bf16.msra.mxu1 %v2501_v57 }
 0x16c   :  { %920 = vmatprep.subr.bf16.mxu0 %v2417_v11  ;;  %961 = vmatprep.subr.bf16.mxu1 %v2505_v58 }
 0x16f   :  { %921 = vmatpush1.bf16.msra.mxu0 %v2420_v13  ;;  %962 = vmatpush1.bf16.msra.mxu1 %v2508_v59 }
 0x170   :  { %922 = vmatprep.subr.bf16.mxu0 %v2423_v14  ;;  %963 = vmatprep.subr.bf16.mxu1 %v2511_v60 }
 0x173   :  { %923 = vmatpush1.bf16.msra.mxu0 %v2426_v17  ;;  %964 = vmatpush1.bf16.msra.mxu1 %v2514_v61 }
 0x174   :  { %924 = vmatprep.subr.bf16.mxu0 %v2429_v18  ;;  %965 = vmatprep.subr.bf16.mxu1 %v2518_v62 }
 0x177   :  { %925 = vmatpush1.bf16.msra.mxu0 %v2432_v21  ;;  %966 = vmatpush1.bf16.msra.mxu1 %v2521_v63 }
 0x178   :  { %926 = vmatprep.subr.bf16.mxu0 %v2435_v22  ;;  %967 = vmatprep.subr.bf16.mxu1 %v2524_v1 }
 0x17b   :  { %927 = vmatpush1.bf16.msra.mxu0 %v2438_v25  ;;  %968 = vmatpush1.bf16.msra.mxu1 %v2527_v2 }
 0x17c   :  { %928 = vmatprep.subr.bf16.mxu0 %v2441_v26  ;;  %969 = vmatprep.subr.bf16.mxu1 %v2531_v5 }
 0x17f   :  { %929 = vmatpush1.bf16.msra.mxu0 %v2444_v29  ;;  %970 = vmatpush1.bf16.msra.mxu1 %v2534_v6 }
 0x180   :  { %930 = vmatprep.subr.bf16.mxu0 %v2447_v30  ;;  %971 = vmatprep.subr.bf16.mxu1 %v2537_v9 }
 0x183   :  { %931 = vmatpush1.bf16.msra.mxu0 %v2450_v33  ;;  %972 = vmatpush1.bf16.msra.mxu1 %v2540_v10 }
 0x184   :  { %1034 = vmatprep.subr.bf16.mxu0 %v2406_v3  ;;  %1075 = vmatprep.subr.bf16.mxu1 %v2488_v54 }
 0x226   :  { %v832_v16 = vpop.f32.mrf.mxu0  ;;  %v873_v47 = vpop.f32.mrf.mxu1 }
 0x227   :  { %v880_v40 = vadd.f32 %v832_v16, %v2567_v35  ;;  %v882_v12 = vadd.f32 %v873_v47, %v2595_v31 }
 0x228   :  { %v834_v36 = vpop.f32.mrf.mxu0  ;;  %v875_v15 = vpop.f32.mrf.mxu1 }
 0x229   :  { %v1941_v19 = vmul.f32 -1.442695, %v880_v40  ;;  %v881_v0 = vadd.f32 %v834_v36, %v2569_v38  ;;  %v883_v52 = vadd.f32 %v875_v15, %v2597_v49 }
 0x22a   :  { %v836_v37 = vpop.f32.mrf.mxu0  ;;  %v877_v46 = vpop.f32.mrf.mxu1 }
 0x22b   :  { %2137 = vpow2.f32 %v1941_v19  ;;  %v1942_v44 = vmul.f32 -1.442695, %v881_v0  ;;  %v1943_v32 = vmul.f32 -1.442695, %v883_v52 }
 0x22c   :  { %v837_v50 = vpop.f32.mrf.mxu0  ;;  %v878_v39 = vpop.f32.mrf.mxu1 }
 0x22d   :  { %2139 = vpow2.f32 %v1942_v44  ;;  %v1628_v44 = vmax.f32 %v2626_v27, 0.0 }
 0x22e   :  { %2141 = vtanh.f32 %v882_v12 }
 0x22f   :  { %2143 = vpow2.f32 %v1943_v32 }
 0x238   :  { %v2138_v53 = vpop.eup %2137 }
 0x239   :  { %v887_v23 = vadd.f32 1.0, %v2138_v53 }
 0x23a   :  { %v2140_v35 = vpop.eup %2139 }
 0x23b   :  { %2145 = vrcp.f32 %v887_v23  ;;  %v893_v34 = vadd.f32 1.0, %v2140_v35  ;;  %v2142_v38 = vpop.eup %2141 }
 0x23c   :  { %v2144_v16 = vpop.eup %2143 }
 0x23d   :  { %2147 = vrcp.f32 %v893_v34  ;;  %v900_v0 = vadd.f32 1.0, %v2144_v16 }
 0x23f   :  { %2149 = vrcp.f32 %v900_v0 }
 0x248   :  { %v2146_v40 = vpop.eup %2145 }
 0x249   :  { %v904_v36 = vmul.f32 %v2146_v40, %v2142_v38 }
 0x24a   :  { %v2148_v19 = vpop.eup %2147 }
 0x24b   :  { %v903_v37 = vmul.f32 %v2148_v19, %v2623_v48 }
 0x24c   :  { %v2150_v31 = vpop.eup %2149 }
 0x24d   :  { %v2669_v49 = vadd.f32 %v904_v36, %v903_v37 }
 0x24f   :  { %2151 = vtanh.f32 %v2669_v49 }
 0x25c   :  { %v2152_v47 = vpop.eup %2151 }
 0x25d   :  { %v907_v15 = vmul.f32 %v2152_v47, %v2150_v31 }
 0x25f   :  { %v915_v46 = vpack.c.bf16 %v907_v15, %v907_v15  ;;  %v1629_v50 = vmax.f32 %v907_v15, 0.0 }
 0x261   :  { %949 = vmatmul.mubr.bf16.vlgmr.msra.gmra.mxu0 %v915_v46  ;;  %990 = vmatmul.mubr.bf16.vlgmr.msra.gmra.mxu1 %v915_v46  ;;  %v2673_v39 = vpack.c.bf16 %v1629_v50, %v1628_v44  ;;  %v2721_v44 = vld [vmem:[#allocation8 + $0xe0] ss:$16 sps:$4 sm:$0xff]  }
 0x262   :  { %1035 = vmatpush1.bf16.msra.mxu0 %v2408_v4  ;;  %1076 = vmatpush1.bf16.msra.mxu1 %v2492_v55  ;;  %v2731_v50 = vld [vmem:[#allocation8 + $0xc0] ss:$16 sps:$4 sm:$0xff]  }
 0x263   :  { %1036 = vmatprep.subr.bf16.mxu0 %v2411_v7  ;;  %1077 = vmatprep.subr.bf16.mxu1 %v2495_v56 }
 0x264   :  { %1066 = vmatprep.mubr.bf16.mxu0 %v3019_v20  ;;  %1107 = vmatprep.mubr.bf16.mxu1 %v3019_v20 }
 0x266   :  { %1037 = vmatpush1.bf16.msra.mxu0 %v2414_v8  ;;  %1078 = vmatpush1.bf16.msra.mxu1 %v2501_v57 }
 0x267   :  { %1038 = vmatprep.subr.bf16.mxu0 %v2417_v11  ;;  %1079 = vmatprep.subr.bf16.mxu1 %v2505_v58 }
 0x26a   :  { %1039 = vmatpush1.bf16.msra.mxu0 %v2420_v13  ;;  %1080 = vmatpush1.bf16.msra.mxu1 %v2508_v59 }
 0x26b   :  { %1040 = vmatprep.subr.bf16.mxu0 %v2423_v14  ;;  %1081 = vmatprep.subr.bf16.mxu1 %v2511_v60 }
 0x26e   :  { %1041 = vmatpush1.bf16.msra.mxu0 %v2426_v17  ;;  %1082 = vmatpush1.bf16.msra.mxu1 %v2514_v61 }
 0x26f   :  { %1042 = vmatprep.subr.bf16.mxu0 %v2429_v18  ;;  %1083 = vmatprep.subr.bf16.mxu1 %v2518_v62 }
 0x272   :  { %1043 = vmatpush1.bf16.msra.mxu0 %v2432_v21  ;;  %1084 = vmatpush1.bf16.msra.mxu1 %v2521_v63 }
 0x273   :  { %1044 = vmatprep.subr.bf16.mxu0 %v2435_v22  ;;  %1085 = vmatprep.subr.bf16.mxu1 %v2524_v1 }
 0x276   :  { %1045 = vmatpush1.bf16.msra.mxu0 %v2438_v25  ;;  %1086 = vmatpush1.bf16.msra.mxu1 %v2527_v2 }
 0x277   :  { %1046 = vmatprep.subr.bf16.mxu0 %v2441_v26  ;;  %1087 = vmatprep.subr.bf16.mxu1 %v2531_v5 }
 0x27a   :  { %1047 = vmatpush1.bf16.msra.mxu0 %v2444_v29  ;;  %1088 = vmatpush1.bf16.msra.mxu1 %v2534_v6 }
 0x27b   :  { %1048 = vmatprep.subr.bf16.mxu0 %v2447_v30  ;;  %1089 = vmatprep.subr.bf16.mxu1 %v2537_v9 }
 0x27e   :  { %1049 = vmatpush1.bf16.msra.mxu0 %v2450_v33  ;;  %1090 = vmatpush1.bf16.msra.mxu1 %v2540_v10 }
 0x27f   :  { %1152 = vmatprep.subr.bf16.mxu0 %v2406_v3  ;;  %1193 = vmatprep.subr.bf16.mxu1 %v2488_v54 }
 0x321   :  { %v950_v4 = vpop.f32.mrf.mxu0  ;;  %v991_v7 = vpop.f32.mrf.mxu1 }
 0x322   :  { %v998_v8 = vadd.f32 %v950_v4, %v2571_v41  ;;  %v1000_v23 = vadd.f32 %v991_v7, %v2599_v42  ;;  %v2735_v4 = vld [vmem:[#allocation8 + $0xa4] ss:$16 sps:$4 sm:$0xff]   ;;  %v2739_v7 = vld [vmem:[#allocation8 + $0xa0] ss:$16 sps:$4 sm:$0xff]  }
 0x323   :  { %v952_v11 = vpop.f32.mrf.mxu0  ;;  %v993_v13 = vpop.f32.mrf.mxu1 }
 0x324   :  { %v1944_v14 = vmul.f32 -1.442695, %v998_v8  ;;  %v999_v48 = vadd.f32 %v952_v11, %v2573_v43  ;;  %v1001_v3 = vadd.f32 %v993_v13, %v2601_v24  ;;  %v2743_v8 = vld [vmem:[#allocation8 + $0x84] ss:$16 sps:$4 sm:$0xff]  }
 0x325   :  { %v954_v27 = vpop.f32.mrf.mxu0  ;;  %v995_v52 = vpop.f32.mrf.mxu1 }
 0x326   :  { %2153 = vpow2.f32 %v1944_v14  ;;  %v1945_v12 = vmul.f32 -1.442695, %v999_v48  ;;  %v1946_v35 = vmul.f32 -1.442695, %v1001_v3 }
 0x327   :  { %v955_v32 = vpop.f32.mrf.mxu0  ;;  %v996_v53 = vpop.f32.mrf.mxu1 }
 0x328   :  { %2155 = vpow2.f32 %v1945_v12  ;;  %v3021_v12 = vld [vmem:[#allocation21_spill] sm:$0xff] }
 0x329   :  { %2157 = vtanh.f32 %v1000_v23 }
 0x32a   :  { %2159 = vpow2.f32 %v1946_v35 }
 0x333   :  { %v2154_v34 = vpop.eup %2153 }
 0x334   :  { %v1005_v38 = vadd.f32 1.0, %v2154_v34 }
 0x335   :  { %v2156_v41 = vpop.eup %2155 }
 0x336   :  { %2161 = vrcp.f32 %v1005_v38  ;;  %v1011_v16 = vadd.f32 1.0, %v2156_v41  ;;  %v2158_v43 = vpop.eup %2157 }
 0x337   :  { %v2160_v40 = vpop.eup %2159 }
 0x338   :  { %2163 = vrcp.f32 %v1011_v16  ;;  %v1018_v37 = vadd.f32 1.0, %v2160_v40 }
 0x33a   :  { %2165 = vrcp.f32 %v1018_v37 }
 0x343   :  { %v2162_v36 = vpop.eup %2161 }
 0x344   :  { %v1022_v19 = vmul.f32 %v2162_v36, %v2158_v43 }
 0x345   :  { %v2164_v0 = vpop.eup %2163 }
 0x346   :  { %v1021_v31 = vmul.f32 %v2164_v0, %v2669_v49  ;;  %v2725_v49 = vld [vmem:[#allocation8 + $0xc4] ss:$16 sps:$4 sm:$0xff]  }
 0x347   :  { %v2166_v42 = vpop.eup %2165 }
 0x348   :  { %v2714_v24 = vadd.f32 %v1022_v19, %v1021_v31 }
 0x34a   :  { %2167 = vtanh.f32 %v2714_v24 }
 0x357   :  { %v2168_v47 = vpop.eup %2167 }
 0x358   :  { %v2717_v15 = vmul.f32 %v2168_v47, %v2166_v42 }
 0x35a   :  { %v1033_v46 = vpack.c.bf16 %v2717_v15, %v2717_v15  ;;  %v1630_v42 = vmax.f32 %v2717_v15, 0.0  ;;  %v2798_v15 = vld [vmem:[#allocation8 + $0x64] ss:$16 sps:$4 sm:$0xff]  }
 0x35c   :  { %1067 = vmatmul.mubr.bf16.vlgmr.msra.gmra.mxu0 %v1033_v46  ;;  %1108 = vmatmul.mubr.bf16.vlgmr.msra.gmra.mxu1 %v1033_v46 }
 0x35d   :  { %1153 = vmatpush1.bf16.msra.mxu0 %v2721_v44  ;;  %1194 = vmatpush1.bf16.msra.mxu1 %v2492_v55 }
 0x35e   :  { %1154 = vmatprep.subr.bf16.mxu0 %v2725_v49  ;;  %1195 = vmatprep.subr.bf16.mxu1 %v2495_v56 }
 0x35f   :  { %1184 = vmatprep.mubr.bf16.mxu0 %v3019_v20  ;;  %1225 = vmatprep.mubr.bf16.mxu1 %v3019_v20 }
 0x361   :  { %1155 = vmatpush1.bf16.msra.mxu0 %v2731_v50  ;;  %1196 = vmatpush1.bf16.msra.mxu1 %v2501_v57 }
 0x362   :  { %1156 = vmatprep.subr.bf16.mxu0 %v2735_v4  ;;  %1197 = vmatprep.subr.bf16.mxu1 %v2505_v58 }
 0x365   :  { %1157 = vmatpush1.bf16.msra.mxu0 %v2739_v7  ;;  %1198 = vmatpush1.bf16.msra.mxu1 %v2508_v59 }
 0x366   :  { %1158 = vmatprep.subr.bf16.mxu0 %v2743_v8  ;;  %1199 = vmatprep.subr.bf16.mxu1 %v2511_v60 }
 0x369   :  { %1159 = vmatpush1.bf16.msra.mxu0 %v2426_v17  ;;  %1200 = vmatpush1.bf16.msra.mxu1 %v2514_v61  ;;  %v2765_v17 = vld [vmem:[#allocation8 + $0xe4] ss:$16 sps:$4 sm:$0xff]  }
 0x36a   :  { %1160 = vmatprep.subr.bf16.mxu0 %v2429_v18  ;;  %1201 = vmatprep.subr.bf16.mxu1 %v2518_v62 }
 0x36d   :  { %1161 = vmatpush1.bf16.msra.mxu0 %v2432_v21  ;;  %1202 = vmatpush1.bf16.msra.mxu1 %v2521_v63 }
 0x36e   :  { %1162 = vmatprep.subr.bf16.mxu0 %v2435_v22  ;;  %1203 = vmatprep.subr.bf16.mxu1 %v2524_v1 }
 0x371   :  { %1163 = vmatpush1.bf16.msra.mxu0 %v2438_v25  ;;  %1204 = vmatpush1.bf16.msra.mxu1 %v2527_v2 }
 0x372   :  { %1164 = vmatprep.subr.bf16.mxu0 %v2441_v26  ;;  %1205 = vmatprep.subr.bf16.mxu1 %v2531_v5 }
 0x375   :  { %1165 = vmatpush1.bf16.msra.mxu0 %v2444_v29  ;;  %1206 = vmatpush1.bf16.msra.mxu1 %v2534_v6 }
 0x376   :  { %1166 = vmatprep.subr.bf16.mxu0 %v2447_v30  ;;  %1207 = vmatprep.subr.bf16.mxu1 %v2537_v9  ;;  %v3020_v30 = vld [vmem:[#allocation12_spill] sm:$0xff] }
 0x379   :  { %1167 = vmatpush1.bf16.msra.mxu0 %v2450_v33  ;;  %1208 = vmatpush1.bf16.msra.mxu1 %v2540_v10 }
 0x37a   :  { %1270 = vmatprep.subr.bf16.mxu0 %v2765_v17  ;;  %1311 = vmatprep.subr.bf16.mxu1 %v2488_v54 }
 0x41c   :  { %v1068_v18 = vpop.f32.mrf.mxu0  ;;  %v1109_v21 = vpop.f32.mrf.mxu1 }
 0x41d   :  { %v1116_v22 = vadd.f32 %v1068_v18, %v2575_v45  ;;  %v1118_v32 = vadd.f32 %v1109_v21, %v3021_v12  ;;  %v2802_v18 = vld [vmem:[#allocation8 + $0x60] ss:$16 sps:$4 sm:$0xff]   ;;  %v2806_v21 = vld [vmem:[#allocation8 + $0x44] ss:$16 sps:$4 sm:$0xff]  }
 0x41e   :  { %v1070_v25 = vpop.f32.mrf.mxu0  ;;  %v1111_v26 = vpop.f32.mrf.mxu1  ;;  %v3023_v12 = vld [vmem:[#allocation14_spill] sm:$0xff] }
 0x41f   :  { %v1947_v29 = vmul.f32 -1.442695, %v1116_v22  ;;  %v1117_v11 = vadd.f32 %v1070_v25, %v3020_v30  ;;  %v1119_v52 = vadd.f32 %v1111_v26, %v2605_v28  ;;  %v2810_v22 = vld [vmem:[#allocation8 + $0x40] ss:$16 sps:$4 sm:$0xff]   ;;  %v2814_v25 = vld [vmem:[#allocation8 + $0x24] ss:$16 sps:$4 sm:$0xff]  }
 0x420   :  { %v1072_v13 = vpop.f32.mrf.mxu0  ;;  %v1113_v14 = vpop.f32.mrf.mxu1  ;;  %v2818_v26 = vld [vmem:[#allocation8 + $0x20] ss:$16 sps:$4 sm:$0xff]  }
 0x421   :  { %2169 = vpow2.f32 %v1947_v29  ;;  %v1948_v33 = vmul.f32 -1.442695, %v1117_v11  ;;  %v1949_v53 = vmul.f32 -1.442695, %v1119_v52  ;;  %v2822_v29 = vld [vmem:[#allocation8 + $0x4] ss:$16 sps:$4 sm:$0xff]  }
 0x422   :  { %v1073_v48 = vpop.f32.mrf.mxu0  ;;  %v1114_v27 = vpop.f32.mrf.mxu1  ;;  %v2826_v30 = vld [vmem:[#allocation8] ss:$16 sps:$4 sm:$0xff]   ;;  %v3022_v14 = vld [vmem:[#allocation13_spill] sm:$0xff] }
 0x423   :  { %2171 = vpow2.f32 %v1948_v33 }
 0x424   :  { %2173 = vtanh.f32 %v1118_v32 }
 0x425   :  { %2175 = vpow2.f32 %v1949_v53 }
 0x42e   :  { %v2170_v3 = vpop.eup %2169 }
 0x42f   :  { %v1123_v23 = vadd.f32 1.0, %v2170_v3 }
 0x430   :  { %v2172_v45 = vpop.eup %2171 }
 0x431   :  { %2177 = vrcp.f32 %v1123_v23  ;;  %v1129_v35 = vadd.f32 1.0, %v2172_v45  ;;  %v2174_v34 = vpop.eup %2173 }
 0x432   :  { %v2176_v38 = vpop.eup %2175 }
 0x433   :  { %2179 = vrcp.f32 %v1129_v35  ;;  %v1136_v40 = vadd.f32 1.0, %v2176_v38 }
 0x435   :  { %2181 = vrcp.f32 %v1136_v40 }
 0x43e   :  { %v2178_v41 = vpop.eup %2177 }
 0x43f   :  { %v1140_v16 = vmul.f32 %v2178_v41, %v2174_v34  ;;  %v3024_v34 = vld [vmem:[#allocation23_spill] sm:$0xff]  ;;  %v3025_v41 = vld [vmem:[#allocation22_spill] sm:$0xff] }
 0x440   :  { %v2180_v43 = vpop.eup %2179 }
 0x441   :  { %v1139_v36 = vmul.f32 %v2180_v43, %v2714_v24  ;;  %v2794_v24 = vld [vmem:[#allocation8 + $0x80] ss:$16 sps:$4 sm:$0xff]  }
 0x442   :  { %v2182_v19 = vpop.eup %2181 }
 0x443   :  { %v2774_v28 = vadd.f32 %v1140_v16, %v1139_v36 }
 0x445   :  { %2183 = vtanh.f32 %v2774_v28 }
 0x452   :  { %v2184_v0 = vpop.eup %2183 }
 0x453   :  { %v1143_v37 = vmul.f32 %v2184_v0, %v2182_v19 }
 0x455   :  { %v1151_v31 = vpack.c.bf16 %v1143_v37, %v1143_v37  ;;  %v1631_v47 = vmax.f32 %v1143_v37, 0.0 }
 0x457   :  { %1185 = vmatmul.mubr.bf16.vlgmr.msra.gmra.mxu0 %v1151_v31  ;;  %1226 = vmatmul.mubr.bf16.vlgmr.msra.gmra.mxu1 %v1151_v31  ;;  %v2778_v46 = vpack.c.bf16 %v1631_v47, %v1630_v42 }
 0x458   :  { %1271 = vmatpush1.bf16.msra.mxu0 %v2721_v44  ;;  %1312 = vmatpush1.bf16.msra.mxu1 %v2492_v55 }
 0x459   :  { %1272 = vmatprep.subr.bf16.mxu0 %v2725_v49  ;;  %1313 = vmatprep.subr.bf16.mxu1 %v2495_v56 }
 0x45a   :  { %1302 = vmatprep.mubr.bf16.mxu0 %v3019_v20  ;;  %1343 = vmatprep.mubr.bf16.mxu1 %v3019_v20 }
 0x45c   :  { %1273 = vmatpush1.bf16.msra.mxu0 %v2731_v50  ;;  %1314 = vmatpush1.bf16.msra.mxu1 %v2501_v57 }
 0x45d   :  { %1274 = vmatprep.subr.bf16.mxu0 %v2735_v4  ;;  %1315 = vmatprep.subr.bf16.mxu1 %v2505_v58 }
 0x460   :  { %1275 = vmatpush1.bf16.msra.mxu0 %v2739_v7  ;;  %1316 = vmatpush1.bf16.msra.mxu1 %v2508_v59 }
 0x461   :  { %1276 = vmatprep.subr.bf16.mxu0 %v2743_v8  ;;  %1317 = vmatprep.subr.bf16.mxu1 %v2511_v60 }
 0x464   :  { %1277 = vmatpush1.bf16.msra.mxu0 %v2794_v24  ;;  %1318 = vmatpush1.bf16.msra.mxu1 %v2514_v61 }
 0x465   :  { %1278 = vmatprep.subr.bf16.mxu0 %v2798_v15  ;;  %1319 = vmatprep.subr.bf16.mxu1 %v2518_v62 }
 0x468   :  { %1279 = vmatpush1.bf16.msra.mxu0 %v2802_v18  ;;  %1320 = vmatpush1.bf16.msra.mxu1 %v2521_v63 }
 0x469   :  { %1280 = vmatprep.subr.bf16.mxu0 %v2806_v21  ;;  %1321 = vmatprep.subr.bf16.mxu1 %v2524_v1 }
 0x46c   :  { %1281 = vmatpush1.bf16.msra.mxu0 %v2810_v22  ;;  %1322 = vmatpush1.bf16.msra.mxu1 %v2527_v2 }
 0x46d   :  { %1282 = vmatprep.subr.bf16.mxu0 %v2814_v25  ;;  %1323 = vmatprep.subr.bf16.mxu1 %v2531_v5 }
 0x470   :  { %1283 = vmatpush1.bf16.msra.mxu0 %v2818_v26  ;;  %1324 = vmatpush1.bf16.msra.mxu1 %v2534_v6 }
 0x471   :  { %1284 = vmatprep.subr.bf16.mxu0 %v2822_v29  ;;  %1325 = vmatprep.subr.bf16.mxu1 %v2537_v9 }
 0x474   :  { %1285 = vmatpush1.bf16.msra.mxu0 %v2826_v30  ;;  %1326 = vmatpush1.bf16.msra.mxu1 %v2540_v10 }
 0x475   :  { %1388 = vmatprep.subr.bf16.mxu0 %v2765_v17  ;;  %1429 = vmatprep.subr.bf16.mxu1 %v2488_v54 }
 0x517   :  { %v1186_v11 = vpop.f32.mrf.mxu0  ;;  %v1227_v13 = vpop.f32.mrf.mxu1 }
 0x518   :  { %v1234_v33 = vadd.f32 %v1186_v11, %v3022_v14  ;;  %v1236_v54 = vadd.f32 %v1227_v13, %v3025_v41 }
 0x519   :  { %v1188_v48 = vpop.f32.mrf.mxu0  ;;  %v1229_v27 = vpop.f32.mrf.mxu1 }
 0x51a   :  { %v1950_v52 = vmul.f32 -1.442695, %v1234_v33  ;;  %v1235_v32 = vadd.f32 %v1188_v48, %v3023_v12  ;;  %v1237_v38 = vadd.f32 %v1229_v27, %v3024_v34  ;;  %v3029_v12 = vld [vmem:[#allocation24_spill] sm:$0xff] }
 0x51b   :  { %v1190_v53 = vpop.f32.mrf.mxu0  ;;  %v1231_v3 = vpop.f32.mrf.mxu1 }
 0x51c   :  { %2185 = vpow2.f32 %v1950_v52  ;;  %v1951_v23 = vmul.f32 -1.442695, %v1235_v32  ;;  %v1952_v16 = vmul.f32 -1.442695, %v1237_v38 }
 0x51d   :  { %v1191_v45 = vpop.f32.mrf.mxu0  ;;  %v1232_v35 = vpop.f32.mrf.mxu1 }
 0x51e   :  { %2187 = vpow2.f32 %v1951_v23 }
 0x51f   :  { %2189 = vtanh.f32 %v1236_v54 }
 0x520   :  { %2191 = vpow2.f32 %v1952_v16 }
 0x529   :  { %v2186_v43 = vpop.eup %2185 }
 0x52a   :  { %v1241_v40 = vadd.f32 1.0, %v2186_v43 }
 0x52b   :  { %v2188_v36 = vpop.eup %2187 }
 0x52c   :  { %2193 = vrcp.f32 %v1241_v40  ;;  %v1247_v19 = vadd.f32 1.0, %v2188_v36  ;;  %v2190_v0 = vpop.eup %2189 }
 0x52d   :  { %v2192_v37 = vpop.eup %2191 }
 0x52e   :  { %2195 = vrcp.f32 %v1247_v19  ;;  %v1254_v11 = vadd.f32 1.0, %v2192_v37 }
 0x530   :  { %2197 = vrcp.f32 %v1254_v11 }
 0x539   :  { %v2194_v31 = vpop.eup %2193 }
 0x53a   :  { %v1258_v42 = vmul.f32 %v2194_v31, %v2190_v0 }
 0x53b   :  { %v2196_v47 = vpop.eup %2195 }
 0x53c   :  { %v1257_v14 = vmul.f32 %v2196_v47, %v2774_v28 }
 0x53d   :  { %v2198_v13 = vpop.eup %2197 }
 0x53e   :  { %v2837_v33 = vadd.f32 %v1258_v42, %v1257_v14  ;;  %v2298_v14 = vld [vmem:[#allocation8 + $0xe8] ss:$16 sps:$4 sm:$0xff]  }
 0x540   :  { %2199 = vtanh.f32 %v2837_v33 }
 0x54d   :  { %v2200_v48 = vpop.eup %2199 }
 0x54e   :  { %v2840_v27 = vmul.f32 %v2200_v48, %v2198_v13  ;;  %v2300_v13 = vld [vmem:[#allocation8 + $0xc8] ss:$16 sps:$4 sm:$0xff]   ;;  %v2301_v48 = vld [vmem:[#allocation8 + $0xac] ss:$16 sps:$4 sm:$0xff]  }
 0x550   :  { %v1269_v52 = vpack.c.bf16 %v2840_v27, %v2840_v27  ;;  %v1632_v42 = vmax.f32 %v2840_v27, 0.0  ;;  %v2304_v27 = vld [vmem:[#allocation8 + $0x88] ss:$16 sps:$4 sm:$0xff]  }
 0x552   :  { %1303 = vmatmul.mubr.bf16.vlgmr.msra.gmra.mxu0 %v1269_v52  ;;  %1344 = vmatmul.mubr.bf16.vlgmr.msra.gmra.mxu1 %v1269_v52  ;;  %v3030_v52 = vld [vmem:[#allocation17_spill] sm:$0xff] }
 0x553   :  { %1389 = vmatpush1.bf16.msra.mxu0 %v2721_v44  ;;  %1430 = vmatpush1.bf16.msra.mxu1 %v2492_v55  ;;  %v2297_v55 = vld [vmem:[#allocation8 + $0xec] ss:$16 sps:$4 sm:$0xff]  }
 0x554   :  { %1390 = vmatprep.subr.bf16.mxu0 %v2725_v49  ;;  %1431 = vmatprep.subr.bf16.mxu1 %v2495_v56 }
 0x555   :  { %1420 = vmatprep.mubr.bf16.mxu0 %v3019_v20  ;;  %1461 = vmatprep.mubr.bf16.mxu1 %v3019_v20 }
 0x557   :  { %1391 = vmatpush1.bf16.msra.mxu0 %v2731_v50  ;;  %1432 = vmatpush1.bf16.msra.mxu1 %v2501_v57 }
 0x558   :  { %1392 = vmatprep.subr.bf16.mxu0 %v2735_v4  ;;  %1433 = vmatprep.subr.bf16.mxu1 %v2505_v58  ;;  %v3026_v58 = vld [vmem:[#allocation15_spill] sm:$0xff] }
 0x55b   :  { %1393 = vmatpush1.bf16.msra.mxu0 %v2739_v7  ;;  %1434 = vmatpush1.bf16.msra.mxu1 %v2508_v59 }
 0x55c   :  { %1394 = vmatprep.subr.bf16.mxu0 %v2743_v8  ;;  %1435 = vmatprep.subr.bf16.mxu1 %v2511_v60 }
 0x55f   :  { %1395 = vmatpush1.bf16.msra.mxu0 %v2794_v24  ;;  %1436 = vmatpush1.bf16.msra.mxu1 %v2514_v61 }
 0x560   :  { %1396 = vmatprep.subr.bf16.mxu0 %v2798_v15  ;;  %1437 = vmatprep.subr.bf16.mxu1 %v2518_v62 }
 0x563   :  { %1397 = vmatpush1.bf16.msra.mxu0 %v2802_v18  ;;  %1438 = vmatpush1.bf16.msra.mxu1 %v2521_v63  ;;  %v3027_v63 = vld [vmem:[#allocation16_spill] sm:$0xff] }
 0x564   :  { %1398 = vmatprep.subr.bf16.mxu0 %v2806_v21  ;;  %1439 = vmatprep.subr.bf16.mxu1 %v2524_v1 }
 0x567   :  { %1399 = vmatpush1.bf16.msra.mxu0 %v2810_v22  ;;  %1440 = vmatpush1.bf16.msra.mxu1 %v2527_v2 }
 0x568   :  { %1400 = vmatprep.subr.bf16.mxu0 %v2814_v25  ;;  %1441 = vmatprep.subr.bf16.mxu1 %v2531_v5 }
 0x56b   :  { %1401 = vmatpush1.bf16.msra.mxu0 %v2818_v26  ;;  %1442 = vmatpush1.bf16.msra.mxu1 %v2534_v6 }
 0x56c   :  { %1402 = vmatprep.subr.bf16.mxu0 %v2822_v29  ;;  %1443 = vmatprep.subr.bf16.mxu1 %v2537_v9 }
 0x56f   :  { %1403 = vmatpush1.bf16.msra.mxu0 %v2826_v30  ;;  %1444 = vmatpush1.bf16.msra.mxu1 %v2540_v10  ;;  %v3028_v10 = vld [vmem:[#allocation25_spill] sm:$0xff] }
 0x570   :  { %1506 = vmatprep.subr.bf16.mxu0 %v2765_v17  ;;  %1547 = vmatprep.subr.bf16.mxu1 %v2297_v55 }
 0x612   :  { %v1304_v56 = vpop.f32.mrf.mxu0  ;;  %v1345_v57 = vpop.f32.mrf.mxu1 }
 0x613   :  { %v1352_v59 = vadd.f32 %v1304_v56, %v3026_v58  ;;  %v1354_v32 = vadd.f32 %v1345_v57, %v3029_v12  ;;  %v3031_v58 = vld [vmem:[#allocation18_spill] sm:$0xff] }
 0x614   :  { %v1306_v60 = vpop.f32.mrf.mxu0  ;;  %v1347_v61 = vpop.f32.mrf.mxu1 }
 0x615   :  { %v1953_v62 = vmul.f32 -1.442695, %v1352_v59  ;;  %v1353_v1 = vadd.f32 %v1306_v60, %v3027_v63  ;;  %v1355_v17 = vadd.f32 %v1347_v61, %v3028_v10  ;;  %v3032_v63 = vld [vmem:[#allocation27_spill] sm:$0xff] }
 0x616   :  { %v1308_v2 = vpop.f32.mrf.mxu0  ;;  %v1349_v5 = vpop.f32.mrf.mxu1 }
 0x617   :  { %2201 = vpow2.f32 %v1953_v62  ;;  %v1954_v6 = vmul.f32 -1.442695, %v1353_v1  ;;  %v1955_v53 = vmul.f32 -1.442695, %v1355_v17  ;;  %v3033_v2 = vld [vmem:[#allocation26_spill] sm:$0xff] }
 0x618   :  { %v1309_v9 = vpop.f32.mrf.mxu0  ;;  %v1350_v28 = vpop.f32.mrf.mxu1 }
 0x619   :  { %2203 = vpow2.f32 %v1954_v6 }
 0x61a   :  { %2205 = vtanh.f32 %v1354_v32 }
 0x61b   :  { %2207 = vpow2.f32 %v1955_v53 }
 0x624   :  { %v2202_v3 = vpop.eup %2201 }
 0x625   :  { %v1359_v23 = vadd.f32 1.0, %v2202_v3 }
 0x626   :  { %v2204_v45 = vpop.eup %2203 }
 0x627   :  { %2209 = vrcp.f32 %v1359_v23  ;;  %v1365_v35 = vadd.f32 1.0, %v2204_v45  ;;  %v2206_v34 = vpop.eup %2205 }
 0x628   :  { %v2208_v38 = vpop.eup %2207 }
 0x629   :  { %2211 = vrcp.f32 %v1365_v35  ;;  %v1372_v43 = vadd.f32 1.0, %v2208_v38 }
 0x62b   :  { %2213 = vrcp.f32 %v1372_v43  ;;  %v2114_v43 = vld [vmem:[%s2997_s4 + $0x30] sm:$0xff]  }
 0x634   :  { %v2210_v41 = vpop.eup %2209 }
 0x635   :  { %v1376_v54 = vmul.f32 %v2210_v41, %v2206_v34 }
 0x636   :  { %v2212_v16 = vpop.eup %2211 }
 0x637   :  { %v1375_v40 = vmul.f32 %v2212_v16, %v2837_v33  ;;  %v2299_v33 = vld [vmem:[#allocation8 + $0xcc] ss:$16 sps:$4 sm:$0xff]  }
 0x638   :  { %v2214_v19 = vpop.eup %2213 }
 0x639   :  { %v2882_v36 = vadd.f32 %v1376_v54, %v1375_v40  ;;  %v2115_v40 = vld [vmem:[%s2997_s4 + $0x28] sm:$0xff]  }
 0x63b   :  { %2215 = vtanh.f32 %v2882_v36 }
 0x648   :  { %v2216_v0 = vpop.eup %2215 }
 0x649   :  { %v1379_v37 = vmul.f32 %v2216_v0, %v2214_v19  ;;  %v2117_v19 = vld [vmem:[%s2997_s4 + $0x18] sm:$0xff]   ;;  %v2119_v0 = vld [vmem:[%s2997_s4 + $0x8] sm:$0xff]  }
 0x64b   :  { %v1387_v31 = vpack.c.bf16 %v1379_v37, %v1379_v37  ;;  %v1633_v47 = vmax.f32 %v1379_v37, 0.0  ;;  %v2120_v37 = vld [vmem:[%s2997_s4] sm:$0xff]  }
 0x64d   :  { %1421 = vmatmul.mubr.bf16.vlgmr.msra.gmra.mxu0 %v1387_v31  ;;  %1462 = vmatmul.mubr.bf16.vlgmr.msra.gmra.mxu1 %v1387_v31  ;;  %v2886_v11 = vpack.c.bf16 %v1633_v47, %v1632_v42  ;;  %v3034_v47 = vld [vmem:[#allocation19_spill] sm:$0xff] }
 0x64e   :  { %1507 = vmatpush1.bf16.msra.mxu0 %v2721_v44  ;;  %1548 = vmatpush1.bf16.msra.mxu1 %v2298_v14  ;;  %v2302_v44 = vld [vmem:[#allocation8 + $0xa8] ss:$16 sps:$4 sm:$0xff]  }
 0x64f   :  { %1508 = vmatprep.subr.bf16.mxu0 %v2725_v49  ;;  %1549 = vmatprep.subr.bf16.mxu1 %v2299_v33  ;;  %v2303_v49 = vld [vmem:[#allocation8 + $0x8c] ss:$16 sps:$4 sm:$0xff]  }
 0x650   :  { %1538 = vmatprep.mubr.bf16.mxu0 %v3019_v20  ;;  %1579 = vmatprep.mubr.bf16.mxu1 %v3019_v20  ;;  %v2305_v20 = vld [vmem:[#allocation8 + $0x6c] ss:$16 sps:$4 sm:$0xff]  }
 0x652   :  { %1509 = vmatpush1.bf16.msra.mxu0 %v2731_v50  ;;  %1550 = vmatpush1.bf16.msra.mxu1 %v2300_v13  ;;  %v2306_v50 = vld [vmem:[#allocation8 + $0x68] ss:$16 sps:$4 sm:$0xff]  }
 0x653   :  { %1510 = vmatprep.subr.bf16.mxu0 %v2735_v4  ;;  %1551 = vmatprep.subr.bf16.mxu1 %v2301_v48  ;;  %v2307_v4 = vld [vmem:[#allocation8 + $0x4c] ss:$16 sps:$4 sm:$0xff]  }
 0x656   :  { %1511 = vmatpush1.bf16.msra.mxu0 %v2739_v7  ;;  %1552 = vmatpush1.bf16.msra.mxu1 %v2302_v44  ;;  %v2308_v7 = vld [vmem:[#allocation8 + $0x48] ss:$16 sps:$4 sm:$0xff]   ;;  %v3035_v44 = vld [vmem:[#allocation20_spill] sm:$0xff] }
 0x657   :  { %1512 = vmatprep.subr.bf16.mxu0 %v2743_v8  ;;  %1553 = vmatprep.subr.bf16.mxu1 %v2303_v49  ;;  %v2309_v8 = vld [vmem:[#allocation8 + $0x2c] ss:$16 sps:$4 sm:$0xff]  }
 0x65a   :  { %1513 = vmatpush1.bf16.msra.mxu0 %v2794_v24  ;;  %1554 = vmatpush1.bf16.msra.mxu1 %v2304_v27  ;;  %v2310_v24 = vld [vmem:[#allocation8 + $0x28] ss:$16 sps:$4 sm:$0xff]  }
 0x65b   :  { %1514 = vmatprep.subr.bf16.mxu0 %v2798_v15  ;;  %1555 = vmatprep.subr.bf16.mxu1 %v2305_v20  ;;  %v2311_v15 = vld [vmem:[#allocation8 + $0xc] ss:$16 sps:$4 sm:$0xff]  }
 0x65e   :  { %1515 = vmatpush1.bf16.msra.mxu0 %v2802_v18  ;;  %1556 = vmatpush1.bf16.msra.mxu1 %v2306_v50  ;;  %v2312_v18 = vld [vmem:[#allocation8 + $0x8] ss:$16 sps:$4 sm:$0xff]  }
 0x65f   :  { %1516 = vmatprep.subr.bf16.mxu0 %v2806_v21  ;;  %1557 = vmatprep.subr.bf16.mxu1 %v2307_v4  ;;  %v2113_v21 = vld [vmem:[%s2997_s4 + $0x38] sm:$0xff]  }
 0x662   :  { %1517 = vmatpush1.bf16.msra.mxu0 %v2810_v22  ;;  %1558 = vmatpush1.bf16.msra.mxu1 %v2308_v7 }
 0x663   :  { %1518 = vmatprep.subr.bf16.mxu0 %v2814_v25  ;;  %1559 = vmatprep.subr.bf16.mxu1 %v2309_v8  ;;  %v3036_v8 = vld [vmem:[#allocation28_spill] sm:$0xff] }
 0x666   :  { %1519 = vmatpush1.bf16.msra.mxu0 %v2818_v26  ;;  %1560 = vmatpush1.bf16.msra.mxu1 %v2310_v24 }
 0x667   :  { %1520 = vmatprep.subr.bf16.mxu0 %v2822_v29  ;;  %1561 = vmatprep.subr.bf16.mxu1 %v2311_v15 }
 0x66a   :  { %1521 = vmatpush1.bf16.msra.mxu0 %v2826_v30  ;;  %1562 = vmatpush1.bf16.msra.mxu1 %v2312_v18 }
 0x66b   :  { %1983 = vmatprep.subr.bf16.mxu0 %v2113_v21 }
 0x70d   :  { %v1422_v22 = vpop.f32.mrf.mxu0  ;;  %v1463_v25 = vpop.f32.mrf.mxu1 }
 0x70e   :  { %v1470_v55 = vadd.f32 %v1422_v22, %v3030_v52  ;;  %v1472_v5 = vadd.f32 %v1463_v25, %v3033_v2  ;;  %v1962_v25 = vld [vmem:[%s2998_s5] ss:$0 sm:$0xff] }
 0x70f   :  { %v1424_v26 = vpop.f32.mrf.mxu0  ;;  %v1465_v56 = vpop.f32.mrf.mxu1 }
 0x710   :  { %v1956_v57 = vmul.f32 -1.442695, %v1470_v55  ;;  %v1471_v29 = vadd.f32 %v1424_v26, %v3031_v58  ;;  %v1473_v1 = vadd.f32 %v1465_v56, %v3032_v63 }
 0x711   :  { %v1426_v59 = vpop.f32.mrf.mxu0  ;;  %v1467_v60 = vpop.f32.mrf.mxu1 }
 0x712   :  { %2217 = vpow2.f32 %v1956_v57  ;;  %v1957_v30 = vmul.f32 -1.442695, %v1471_v29  ;;  %v1958_v6 = vmul.f32 -1.442695, %v1473_v1 }
 0x713   :  { %v1427_v61 = vpop.f32.mrf.mxu0  ;;  %v1468_v62 = vpop.f32.mrf.mxu1 }
 0x714   :  { %2219 = vpow2.f32 %v1957_v30 }
 0x715   :  { %2221 = vtanh.f32 %v1472_v5 }
 0x716   :  { %2223 = vpow2.f32 %v1958_v6 }
 0x71f   :  { %v2218_v9 = vpop.eup %2217 }
 0x720   :  { %v1477_v28 = vadd.f32 1.0, %v2218_v9 }
 0x721   :  { %v2220_v10 = vpop.eup %2219 }
 0x722   :  { %2225 = vrcp.f32 %v1477_v28  ;;  %v1483_v17 = vadd.f32 1.0, %v2220_v10  ;;  %v2222_v12 = vpop.eup %2221 }
 0x723   :  { %v2224_v32 = vpop.eup %2223 }
 0x724   :  { %2227 = vrcp.f32 %v1483_v17  ;;  %v1490_v45 = vadd.f32 1.0, %v2224_v32 }
 0x726   :  { %2229 = vrcp.f32 %v1490_v45 }
 0x72f   :  { %v2226_v53 = vpop.eup %2225 }
 0x730   :  { %v1494_v3 = vmul.f32 %v2226_v53, %v2222_v12 }
 0x731   :  { %v2228_v23 = vpop.eup %2227 }
 0x732   :  { %v1493_v35 = vmul.f32 %v2228_v23, %v2882_v36  ;;  %v2116_v36 = vld [vmem:[%s2997_s4 + $0x20] sm:$0xff]  }
 0x733   :  { %v2230_v38 = vpop.eup %2229 }
 0x734   :  { %v2913_v34 = vadd.f32 %v1494_v3, %v1493_v35 }
 0x736   :  { %2231 = vtanh.f32 %v2913_v34 }
 0x743   :  { %v2232_v41 = vpop.eup %2231 }
 0x744   :  { %v2916_v54 = vmul.f32 %v2232_v41, %v2230_v38 }
 0x746   :  { %v1505_v16 = vpack.c.bf16 %v2916_v54, %v2916_v54  ;;  %v1634_v28 = vmax.f32 %v2916_v54, 0.0 }
 0x748   :  { %1539 = vmatmul.mubr.bf16.vlgmr.msra.gmra.mxu0 %v1505_v16  ;;  %1580 = vmatmul.mubr.bf16.vlgmr.msra.gmra.mxu1 %v1505_v16 }
 0x749   :  { %1984 = vmatpush3.bf16.msra.mxu0 %v2113_v21  ;;  %1999 = vmatprep.mubr.bf16.mxu0 %v2673_v39  ;;  %v2118_v39 = vld [vmem:[%s2997_s4 + $0x10] sm:$0xff]  }
 0x74a   :  { %1985 = vmatprep.subr.bf16.mxu0 %v2114_v43 }
 0x74d   :  { %1986 = vmatpush3.bf16.msra.mxu0 %v2114_v43 }
 0x74e   :  { %1987 = vmatprep.subr.bf16.mxu0 %v2115_v40 }
 0x751   :  { %1988 = vmatpush3.bf16.msra.mxu0 %v2115_v40 }
 0x752   :  { %1989 = vmatprep.subr.bf16.mxu0 %v2116_v36 }
 0x755   :  { %1990 = vmatpush3.bf16.msra.mxu0 %v2116_v36 }
 0x756   :  { %1991 = vmatprep.subr.bf16.mxu0 %v2117_v19 }
 0x759   :  { %1992 = vmatpush3.bf16.msra.mxu0 %v2117_v19 }
 0x75a   :  { %1993 = vmatprep.subr.bf16.mxu0 %v2118_v39 }
 0x75d   :  { %1994 = vmatpush3.bf16.msra.mxu0 %v2118_v39 }
 0x75e   :  { %1995 = vmatprep.subr.bf16.mxu0 %v2119_v0 }
 0x761   :  { %1996 = vmatpush3.bf16.msra.mxu0 %v2119_v0 }
 0x762   :  { %1997 = vmatprep.subr.bf16.mxu0 %v2120_v37 }
 0x765   :  { %1998 = vmatpush3.bf16.msra.mxu0 %v2120_v37 }
 0x768   :  { %2000 = vmatmul.mubr.bf16.vlgmr.msra.gmra.mxu0 %v2778_v46 }
 0x769   :  { %2003 = vmatprep.mubr.bf16.mxu0 %v2886_v11 }
 0x808   :  { %v1540_v31 = vpop.f32.mrf.mxu0  ;;  %v1581_v42 = vpop.f32.mrf.mxu1 }
 0x809   :  { %v1588_v14 = vadd.f32 %v1540_v31, %v3034_v47  ;;  %v1590_v11 = vadd.f32 %v1581_v42, %v3036_v8 }
 0x80a   :  { %v1542_v33 = vpop.f32.mrf.mxu0  ;;  %v1583_v13 = vpop.f32.mrf.mxu1 }
 0x80b   :  { %v1959_v48 = vmul.f32 -1.442695, %v1588_v14  ;;  %v1589_v49 = vadd.f32 %v1542_v33, %v3035_v44  ;;  %v1591_v46 = vadd.f32 %v1583_v13, %v2621_v51 }
 0x80c   :  { %v1544_v27 = vpop.f32.mrf.mxu0  ;;  %v1585_v20 = vpop.f32.mrf.mxu1 }
 0x80d   :  { %2233 = vpow2.f32 %v1959_v48  ;;  %v1960_v50 = vmul.f32 -1.442695, %v1589_v49  ;;  %v1961_v24 = vmul.f32 -1.442695, %v1591_v46 }
 0x80e   :  { %v1545_v4 = vpop.f32.mrf.mxu0  ;;  %v1586_v7 = vpop.f32.mrf.mxu1 }
 0x80f   :  { %2235 = vpow2.f32 %v1960_v50 }
 0x810   :  { %2237 = vtanh.f32 %v1590_v11 }
 0x811   :  { %2239 = vpow2.f32 %v1961_v24 }
 0x81a   :  { %v2234_v15 = vpop.eup %2233 }
 0x81b   :  { %v1595_v18 = vadd.f32 1.0, %v2234_v15 }
 0x81c   :  { %v2236_v21 = vpop.eup %2235 }
 0x81d   :  { %2241 = vrcp.f32 %v1595_v18  ;;  %v1601_v22 = vadd.f32 1.0, %v2236_v21  ;;  %v2238_v52 = vpop.eup %2237 }
 0x81e   :  { %v2240_v26 = vpop.eup %2239 }
 0x81f   :  { %2243 = vrcp.f32 %v1601_v22  ;;  %v1608_v60 = vadd.f32 1.0, %v2240_v26 }
 0x821   :  { %2245 = vrcp.f32 %v1608_v60 }
 0x828   :  { %v2001_v55 = vpop.f32.mrf.mxu0 }
 0x829   :  { %v1754_v56 = vadd.f32 %v2001_v55, %v1962_v25 }
 0x82a   :  { %v2242_v51 = vpop.eup %2241  ;;  %v1745_v57 = vpop.f32.mrf.mxu0 }
 0x82b   :  { %v1612_v58 = vmul.f32 %v2242_v51, %v2238_v52  ;;  %v1746_v29 = vadd.f32 %v1962_v25, %v1745_v57  ;;  %1780 = vmax.xlane.f32.xlu1 %v1754_v56 }
 0x82c   :  { %v2244_v59 = vpop.eup %2243  ;;  %v2002_v30 = vpop.f32.mrf.mxu0 }
 0x82d   :  { %v1611_v61 = vmul.f32 %v2244_v59, %v2913_v34  ;;  %v1757_v62 = vadd.f32 %v2002_v30, %v1962_v25  ;;  %1776 = vmax.xlane.f32.xlu0 %v1746_v29 }
 0x82e   :  { %v1748_v63 = vpop.f32.mrf.mxu0  ;;  %v2246_v5 = vpop.eup %2245 }
 0x82f   :  { %v1749_v1 = vadd.f32 %v1962_v25, %v1748_v63  ;;  %1782 = vmax.xlane.f32.xlu1 %v1757_v62  ;;  %v1613_v2 = vadd.f32 %v1612_v58, %v1611_v61 }
 0x831   :  { %1778 = vmax.xlane.f32.xlu0 %v1749_v1  ;;  %2247 = vtanh.f32 %v1613_v2 }
 0x83e   :  { %v2248_v6 = vpop.eup %2247 }
 0x83f   :  { %v1615_v9 = vmul.f32 %v2248_v6, %v2246_v5 }
 0x841   :  { %v1635_v10 = vmax.f32 %v1615_v9, 0.0 }
 0x843   :  { %v1639_v17 = vpack.c.bf16 %v1635_v10, %v1634_v28 }
 0x845   :  { %2004 = vmatmul.mubr.bf16.gmra.mxu0 %v1639_v17 }
 0x8b4   :  { %v1781_v32 = vpop.xlane.xlu1 %1780 }
 0x8b5   :  { %v2955_v23 = vsub.f32 %v1754_v56, %v1781_v32 }
 0x8b6   :  { %v1777_v12 = vpop.xlane.xlu0 %1776 }
 0x8b7   :  { %v2953_v53 = vsub.f32 %v1746_v29, %v1777_v12  ;;  %v1804_v38 = vmul.f32 1.442695, %v2955_v23 }
 0x8b8   :  { %v1783_v34 = vpop.xlane.xlu1 %1782 }
 0x8b9   :  { %v1800_v45 = vmul.f32 1.442695, %v2953_v53  ;;  %v2961_v41 = vsub.f32 %v1757_v62, %v1783_v34 }
 0x8ba   :  { %v1779_v3 = vpop.xlane.xlu0 %1778 }
 0x8bb   :  { %v2958_v35 = vsub.f32 %v1749_v1, %v1779_v3  ;;  %2249 = vpow2.f32 %v1800_v45  ;;  %v1806_v40 = vmul.f32 1.442695, %v2961_v41 }
 0x8bc   :  { %2251 = vpow2.f32 %v1804_v38 }
 0x8bd   :  { %v1802_v54 = vmul.f32 1.442695, %v2958_v35 }
 0x8bf   :  { %2253 = vpow2.f32 %v1802_v54 }
 0x8c0   :  { %2255 = vpow2.f32 %v1806_v40 }
 0x8c8   :  { %v2250_v42 = vpop.eup %2249 }
 0x8c9   :  { %v2252_v47 = vpop.eup %2251 }
 0x8cc   :  { %v2254_v14 = vpop.eup %2253 }
 0x8cd   :  { %v2256_v33 = vpop.eup %2255 }
 0x905   :  { %v2005_v16 = vpop.f32.mrf.mxu0 }
 0x906   :  { %v1770_v0 = vadd.f32 %v2005_v16, %v1962_v25 }
 0x907   :  { %v1761_v43 = vpop.f32.mrf.mxu0 }
 0x908   :  { %v1762_v36 = vadd.f32 %v1962_v25, %v1761_v43 }
 0x909   :  { %v2006_v19 = vpop.f32.mrf.mxu0 }
 0x90a   :  { %1784 = vmax.xlane.f32.xlu0 %v1762_v36  ;;  %v1773_v31 = vadd.f32 %v2006_v19, %v1962_v25 }
 0x90b   :  { %v1764_v39 = vpop.f32.mrf.mxu0 }
 0x90c   :  { %v1765_v37 = vadd.f32 %v1962_v25, %v1764_v39 }
 0x90e   :  { %1786 = vmax.xlane.f32.xlu1 %v1765_v37  ;;  %1788 = vmax.xlane.f32.xlu0 %v1770_v0 }
 0x912   :  { %1790 = vmax.xlane.f32.xlu1 %v1773_v31  ;;  %1816 = vadd.xlane.f32.xlu0 %v2250_v42 }
 0x916   :  { %1820 = vadd.xlane.f32.xlu0 %v2252_v47  ;;  %1818 = vadd.xlane.f32.xlu1 %v2254_v14 }
 0x91a   :  { %1822 = vadd.xlane.f32.xlu1 %v2256_v33 }
 0x993   :  { %v1785_v13 = vpop.xlane.xlu0 %1784 }
 0x994   :  { %v1796_v48 = vsub.f32 %v1762_v36, %v1785_v13 }
 0x996   :  { %v1808_v44 = vmul.f32 1.442695, %v1796_v48 }
 0x997   :  { %v1787_v49 = vpop.xlane.xlu1 %1786  ;;  %v1789_v27 = vpop.xlane.xlu0 %1788 }
 0x998   :  { %2257 = vpow2.f32 %v1808_v44  ;;  %v1797_v20 = vsub.f32 %v1765_v37, %v1787_v49  ;;  %v1798_v50 = vsub.f32 %v1770_v0, %v1789_v27 }
 0x99a   :  { %v1810_v4 = vmul.f32 1.442695, %v1797_v20  ;;  %v1812_v7 = vmul.f32 1.442695, %v1798_v50 }
 0x99b   :  { %v1791_v46 = vpop.xlane.xlu1 %1790  ;;  %v1817_v8 = vpop.xlane.xlu0 %1816 }
 0x99c   :  { %2259 = vpow2.f32 %v1810_v4  ;;  %v1799_v11 = vsub.f32 %v1773_v31, %v1791_v46 }
 0x99d   :  { %2261 = vpow2.f32 %v1812_v7 }
 0x99e   :  { %v1814_v24 = vmul.f32 1.442695, %v1799_v11  ;;  %2263 = vlog2.f32 %v1817_v8 }
 0x99f   :  { %v1819_v15 = vpop.xlane.xlu1 %1818  ;;  %v1821_v18 = vpop.xlane.xlu0 %1820 }
 0x9a0   :  { %2265 = vpow2.f32 %v1814_v24 }
 0x9a1   :  { %2267 = vlog2.f32 %v1819_v15 }
 0x9a2   :  { %2269 = vlog2.f32 %v1821_v18 }
 0x9a3   :  { %v1823_v21 = vpop.xlane.xlu1 %1822 }
 0x9a4   :  { %2271 = vlog2.f32 %v1823_v21 }
 0x9a5   :  { %v2258_v22 = vpop.eup %2257 }
 0x9a6   :  { %1824 = vadd.xlane.f32.xlu0 %v2258_v22 }
 0x9a9   :  { %v2260_v25 = vpop.eup %2259 }
 0x9aa   :  { %v2262_v52 = vpop.eup %2261  ;;  %1826 = vadd.xlane.f32.xlu1 %v2260_v25 }
 0x9ab   :  { %v2264_v55 = vpop.eup %2263  ;;  %1828 = vadd.xlane.f32.xlu0 %v2262_v52 }
 0x9ac   :  { %v1833_v26 = vmul.f32 0.6931472, %v2264_v55 }
 0x9ad   :  { %v2266_v56 = vpop.eup %2265 }
 0x9ae   :  { %v2268_v51 = vpop.eup %2267  ;;  %v1848_v57 = vsub.f32 %v2953_v53, %v1833_v26  ;;  %1830 = vadd.xlane.f32.xlu1 %v2266_v56 }
 0x9af   :  { %v2270_v58 = vpop.eup %2269  ;;  %v1835_v29 = vmul.f32 0.6931472, %v2268_v51 }
 0x9b0   :  { %1856 = vst [vmem:[%s2999_s6] sm:$0xff] %v1848_v57  ;;  %v1837_v59 = vmul.f32 0.6931472, %v2270_v58 }
 0x9b1   :  { %v2272_v60 = vpop.eup %2271  ;;  %v1849_v30 = vsub.f32 %v2958_v35, %v1835_v29 }
 0x9b2   :  { %v1850_v61 = vsub.f32 %v2955_v23, %v1837_v59  ;;  %v1839_v62 = vmul.f32 0.6931472, %v2272_v60 }
 0x9b3   :  { %1857 = vst [vmem:[%s2999_s6 + $0x8] sm:$0xff] %v1849_v30 }
 0x9b4   :  { %1858 = vst [vmem:[%s2999_s6 + $0x10] sm:$0xff] %v1850_v61  ;;  %v1851_v63 = vsub.f32 %v2961_v41, %v1839_v62 }
 0x9b6   :  { %1859 = vst [vmem:[%s2999_s6 + $0x18] sm:$0xff] %v1851_v63 }
 0xa2f   :  { %v1825_v1 = vpop.xlane.xlu0 %1824 }
 0xa30   :  { %2273 = vlog2.f32 %v1825_v1 }
 0xa33   :  { %v1827_v2 = vpop.xlane.xlu1 %1826 }
 0xa34   :  { %2275 = vlog2.f32 %v1827_v2  ;;  %v1829_v5 = vpop.xlane.xlu0 %1828 }
 0xa35   :  { %2277 = vlog2.f32 %v1829_v5 }
 0xa37   :  { %v1831_v6 = vpop.xlane.xlu1 %1830 }
 0xa38   :  { %2279 = vlog2.f32 %v1831_v6 }
 0xa3d   :  { %v2274_v9 = vpop.eup %2273 }
 0xa3e   :  { %v1841_v28 = vmul.f32 0.6931472, %v2274_v9 }
 0xa40   :  { %v1852_v10 = vsub.f32 %v1796_v48, %v1841_v28 }
 0xa41   :  { %v2276_v17 = vpop.eup %2275 }
 0xa42   :  { %v2278_v12 = vpop.eup %2277  ;;  %1860 = vst [vmem:[%s2999_s6 + $0x20] sm:$0xff] %v1852_v10  ;;  %v1843_v32 = vmul.f32 0.6931472, %v2276_v17 }
 0xa43   :  { %v1845_v53 = vmul.f32 0.6931472, %v2278_v12 }
 0xa44   :  { %v1853_v3 = vsub.f32 %v1797_v20, %v1843_v32 }
 0xa45   :  { %v2280_v23 = vpop.eup %2279  ;;  %v1854_v45 = vsub.f32 %v1798_v50, %v1845_v53 }
 0xa46   :  { %1861 = vst [vmem:[%s2999_s6 + $0x28] sm:$0xff] %v1853_v3  ;;  %v1847_v35 = vmul.f32 0.6931472, %v2280_v23 }
 0xa47   :  { %1862 = vst [vmem:[%s2999_s6 + $0x30] sm:$0xff] %v1854_v45 }
 0xa48   :  { %v1855_v34 = vsub.f32 %v1799_v11, %v1847_v35 }
 0xa4a   :  { %1863 = vst [vmem:[%s2999_s6 + $0x38] sm:$0xff] %v1855_v34 }
 0xa4b   :  { %1868 = vsyncpa [#allocation7], 1 }
 0xa4c   :  { %1869 = vsyncpa [#allocation9], 1 }

</bundles_post_ra>
